<compile_context>
chip_gen: v7x
topology: tpu7x:2x2x1
jax: 0.10.0
libtpu: 0.0.40
codegen_flags: <defaults>
</compile_context>

<pallas_src>
import functools

import jax
import jax.numpy as jnp
from jax import lax
from jax.experimental import pallas as pl
from jax.experimental.pallas import tpu as pltpu


# ----------------------------------------------------------------------------
# Static helpers (pure Python; all shapes/tiles are static).
# ----------------------------------------------------------------------------
def _round_up(x, m):
    return ((x + m - 1) // m) * m


@functools.lru_cache(maxsize=None)
def _vmem_capacity_bytes():
    try:
        return int(pltpu.get_tpu_info().vmem_capacity_bytes)
    except Exception:
        return 64 * 1024 * 1024  # conservative default (v7x per-TC VMEM)


@functools.lru_cache(maxsize=None)
def _device_kind():
    try:
        return jax.devices()[0].device_kind.lower()
    except Exception:
        return ""


def _num_tensorcores():
    kind = _device_kind()
    return 2 if ("v7" in kind or "7x" in kind) else 1


def _is_v5e():
    kind = _device_kind()
    return ("v5e" in kind) or ("v5 lite" in kind) or ("v5litepod" in kind)


def _pick_tiles(M, N, K):
    """MXU-friendly, VMEM-budgeted tile selection for f32 operands."""
    vmem_cap = _vmem_capacity_bytes()
    num_tc = _num_tensorcores()

    Mp = _round_up(M, 8)       # sublane multiple
    Np = _round_up(N, 128)     # lane-dense output
    Kp = _round_up(K, 128)

    big_vmem = vmem_cap >= 96 * 1024 * 1024  # v5e/v6e: 128 MiB; v7x: 64 MiB
    tm = min(512, Mp)
    tn = min(1024, Np)
    tk = min(1024 if big_vmem else 512, Kp)

    # Megacore split: only useful on multi-TC chips (v7x). Split M first so
    # tn stays lane-dense and a 256-multiple for the 2x256^2 MXU.
    if num_tc > 1 and pl.cdiv(M, tm) * pl.cdiv(N, tn) == 1:
        if Mp >= 16:
            tm = max(8, _round_up(pl.cdiv(Mp, 2), 8))
        elif Np >= 256:
            tn = max(128, _round_up(pl.cdiv(Np, 2), 128))

    # Footprint: double-buffered x, up-to-triple-buffered w (v5e path),
    # double-buffered bias + output. Shrink (alignment-preserving) if over
    # ~60% of physical VMEM — protects v7x's 64 MiB.
    budget = int(0.6 * vmem_cap)

    def footprint(tm_, tn_, tk_):
        return 4 * (2 * tm_ * tk_ + 3 * tk_ * tn_ + 2 * tn_ + 2 * tm_ * tn_)

    while footprint(tm, tn, tk) > budget and tk > 128:
        tk = max(128, _round_up(tk // 2, 128))
    while footprint(tm, tn, tk) > budget and tn > 128:
        tn = max(128, _round_up(tn // 2, 128))
    while footprint(tm, tn, tk) > budget and tm > 8:
        tm = max(8, _round_up(tm // 2, 8))

    return tm, tn, tk


# ----------------------------------------------------------------------------
# Kernels.
# ----------------------------------------------------------------------------
def _mask_k_tail(x_t, w_t, valid):
    """Zero the K-tail of both operands (OOB reads are undefined on TPU)."""
    kc = lax.broadcasted_iota(jnp.int32, x_t.shape, 1)
    x_t = jnp.where(kc < valid, x_t, jnp.zeros_like(x_t))
    kr = lax.broadcasted_iota(jnp.int32, w_t.shape, 0)
    w_t = jnp.where(kr < valid, w_t, jnp.zeros_like(w_t))
    return x_t, w_t


def _gemm_kernel_multi_k(*refs, tk, k_rem, has_bias, bf16):
    """One (tm, tn) output tile; grid axis 2 walks the K reduction.

    Accumulates directly into o_ref (f32), initialized with the bias tile.
    """
    if has_bias:
        x_ref, w_ref, b_ref, o_ref = refs
    else:
        x_ref, w_ref, o_ref = refs

    k = pl.program_id(2)
    nk = pl.num_programs(2)

    @pl.when(k == 0)
    def _():
        if has_bias:
            o_ref[...] = jnp.broadcast_to(b_ref[...], o_ref.shape).astype(o_ref.dtype)
        else:
            o_ref[...] = jnp.zeros_like(o_ref)

    x_t = x_ref[...]
    w_t = w_ref[...]
    if k_rem:  # static: K not divisible by tk -> mask the last K block
        valid = jnp.where(k == nk - 1, k_rem, tk)
        x_t, w_t = _mask_k_tail(x_t, w_t, valid)
    if bf16:
        x_t = x_t.astype(jnp.bfloat16)
        w_t = w_t.astype(jnp.bfloat16)

    o_ref[...] += jnp.dot(x_t, w_t, preferred_element_type=jnp.float32).astype(
        o_ref.dtype
    )


def _gemm_kernel_single_k(*refs, k_rem, has_bias, bf16):
    """K fits in one block: no K-grid axis, no init/finalize gating."""
    if has_bias:
        x_ref, w_ref, b_ref, o_ref = refs
    else:
        x_ref, w_ref, o_ref = refs

    x_t = x_ref[...]
    w_t = w_ref[...]
    if k_rem:  # static: K < tk -> mask the K tail
        x_t, w_t = _mask_k_tail(x_t, w_t, k_rem)
    if bf16:
        x_t = x_t.astype(jnp.bfloat16)
        w_t = w_t.astype(jnp.bfloat16)

    acc = jnp.dot(x_t, w_t, preferred_element_type=jnp.float32)
    if has_bias:
        acc = acc + b_ref[...]
    o_ref[...] = acc.astype(o_ref.dtype)


# ----------------------------------------------------------------------------
# Pallas wrapper.
# ----------------------------------------------------------------------------
@functools.partial(jax.jit, static_argnames=("tm", "tn", "tk", "use_bf16"))
def _pallas_linear(x, weight, bias2d, *, tm, tn, tk, use_bf16=False):
    M, K = x.shape
    _, N = weight.shape
    has_bias = bias2d is not None

    gm = pl.cdiv(M, tm)
    gn = pl.cdiv(N, tn)
    gk = pl.cdiv(K, tk)
    k_rem = K % tk  # static; 0 when K divides evenly

    cost = pl.CostEstimate(
        flops=2 * M * N * K,
        bytes_accessed=4 * (M * K * gn + K * N * gm + M * N + (N if has_bias else 0)),
        transcendentals=0,
    )

    # v5e: low HBM BW + short f32 per-K-step compute -> triple-buffer weights.
    buffered_w = _is_v5e() and gk > 1
    wbuf = 3 if buffered_w else 2
    est = 4 * (2 * tm * tk + wbuf * tk * tn + 2 * tn + 2 * tm * tn)
    vmem_limit = min(
        int(0.8 * _vmem_capacity_bytes()), max(32 * 1024 * 1024, 2 * est)
    )

    out_shape = jax.ShapeDtypeStruct((M, N), x.dtype)
    args = (x, weight) + ((bias2d,) if has_bias else ())

    if gk == 1:
        kernel = functools.partial(
            _gemm_kernel_single_k, k_rem=k_rem, has_bias=has_bias, bf16=use_bf16
        )
        in_specs = [
            pl.BlockSpec((tm, tk), lambda i, j: (i, 0)),   # x tile
            pl.BlockSpec((tk, tn), lambda i, j: (0, j)),   # w tile
        ]
        if has_bias:
            in_specs.append(pl.BlockSpec((1, tn), lambda i, j: (0, j)))
        return pl.pallas_call(
            kernel,
            out_shape=out_shape,
            grid_spec=pltpu.PrefetchScalarGridSpec(
                num_scalar_prefetch=0,
                grid=(gm, gn),
                in_specs=in_specs,
                out_specs=pl.BlockSpec((tm, tn), lambda i, j: (i, j)),
            ),
            compiler_params=pltpu.CompilerParams(
                dimension_semantics=("parallel", "parallel"),
                vmem_limit_bytes=vmem_limit,
            ),
            cost_estimate=cost,
        )(*args)

    kernel = functools.partial(
        _gemm_kernel_multi_k, tk=tk, k_rem=k_rem, has_bias=has_bias, bf16=use_bf16
    )
    if buffered_w:
        w_spec = pl.BlockSpec(
            (tk, tn), lambda i, j, k: (k, j), pipeline_mode=pl.Buffered(3)
        )
    else:
        w_spec = pl.BlockSpec((tk, tn), lambda i, j, k: (k, j))
    in_specs = [
        pl.BlockSpec((tm, tk), lambda i, j, k: (i, k)),   # x tile
        w_spec,                                           # w tile
    ]
    if has_bias:
        in_specs.append(pl.BlockSpec((1, tn), lambda i, j, k: (0, j)))
    return pl.pallas_call(
        kernel,
        out_shape=out_shape,
        grid_spec=pltpu.PrefetchScalarGridSpec(
            num_scalar_prefetch=0,
            grid=(gm, gn, gk),
            in_specs=in_specs,
            out_specs=pl.BlockSpec((tm, tn), lambda i, j, k: (i, j)),
        ),
        compiler_params=pltpu.CompilerParams(
            dimension_semantics=("parallel", "parallel", "arbitrary"),
            vmem_limit_bytes=vmem_limit,
        ),
        cost_estimate=cost,
    )(*args)


def custom_linear_gemm(x, weight, bias=None, *, tm=None, tn=None, tk=None,
                       use_bf16_compute=False):
    """Forward pass of CustomLinearGEMM: x @ weight (+ bias)."""
    if x.ndim != 2 or x.shape[-1] != weight.shape[0]:
        raise ValueError(
            f"Input shape mismatch. Expected (*, {weight.shape[0]}), "
            f"but got {x.shape}."
        )
    M, K = x.shape
    _, N = weight.shape

    bias2d = None if bias is None else bias.reshape(1, N)

    # Tiny-problem fast path: a Pallas launch + <128-lane masked stores is
    # pure overhead here; XLA's fused matmul is strictly better.
    if (M < 128 and N < 128 and K < 128
            and tm is None and tn is None and tk is None):
        out = x @ weight
        return out if bias is None else out + bias

    atm, atn, atk = _pick_tiles(M, N, K)
    tm = tm or atm
    tn = tn or atn
    tk = tk or atk
    return _pallas_linear(x, weight, bias2d, tm=tm, tn=tn, tk=tk,
                          use_bf16=use_bf16_compute)


if __name__ == "__main__":
    key = jax.random.PRNGKey(0)
    k1, k2, k3, k4, k5, k6, k7, k8 = jax.random.split(key, 8)

    # 1) Small demo shapes matching the PyTorch module defaults
    #    (takes the tiny-shape XLA fallback path by design).
    batch, in_features, out_features = 8, 32, 32
    x_s = jax.random.normal(k1, (batch, in_features), dtype=jnp.float32)
    w_s = jax.random.normal(k2, (in_features, out_features), dtype=jnp.float32)
    b_s = jax.random.normal(k3, (out_features,), dtype=jnp.float32)
    out_s = jax.block_until_ready(custom_linear_gemm(x_s, w_s, b_s))
    ref_s = x_s @ w_s + b_s
    assert out_s.shape == (batch, out_features)
    assert jnp.allclose(out_s, ref_s, atol=1e-3, rtol=1e-3), "small-shape mismatch"

    # 2) Non-divisible M/N, single-K-block Pallas path (partial edge tiles,
    #    no padded copies), with bias.
    M, K, N = 200, 384, 320
    x_l = jax.random.normal(k4, (M, K), dtype=jnp.float32)
    w_l = jax.random.normal(k5, (K, N), dtype=jnp.float32)
    b_l = jax.random.normal(k6, (N,), dtype=jnp.float32)
    out_l = jax.block_until_ready(custom_linear_gemm(x_l, w_l, b_l))
    ref_l = x_l @ w_l + b_l
    assert out_l.shape == (M, N)
    assert jnp.allclose(out_l, ref_l, atol=2e-3, rtol=2e-3), "single-K mismatch"

    # 3) Multi-K-block path with a ragged K tail (in-kernel K masking) and
    #    the no-bias kernel variant.
    M2, K2, N2 = 136, 1160, 320
    x_m = jax.random.normal(k7, (M2, K2), dtype=jnp.float32)
    w_m = jax.random.normal(k8, (K2, N2), dtype=jnp.float32)
    out_m = jax.block_until_ready(custom_linear_gemm(x_m, w_m, None))
    ref_m = x_m @ w_m
    assert out_m.shape == (M2, N2)
    assert jnp.allclose(out_m, ref_m, atol=5e-3, rtol=2e-3), "multi-K mismatch"

    print("KERNEL_OK")
</pallas_src>

<mosaic_0001>
module attributes {stable_mosaic.version = 11 : i64} {
  func.func @_gemm_kernel_single_k(%arg0: i32, %arg1: i32, %arg2: memref<200x384xf32, #tpu.memory_space<vmem>>, %arg3: memref<384x384xf32, #tpu.memory_space<vmem>>, %arg4: memref<1x384xf32, #tpu.memory_space<vmem>>, %arg5: memref<200x384xf32, #tpu.memory_space<vmem>>) attributes {dimension_semantics = [#tpu.dimension_semantics<parallel>, #tpu.dimension_semantics<parallel>], iteration_bounds = array<i64: 1, 1>, scalar_prefetch = 0 : i64, scratch_operands = 0 : i64, tpu.core_type = #tpu.core_type<tc>, window_params = [{transform_indices = @transform_0, window_bounds = array<i64: 200, 384>}, {transform_indices = @transform_1, window_bounds = array<i64: 384, 384>}, {transform_indices = @transform_2, window_bounds = array<i64: 1, 384>}, {transform_indices = @transform_3, window_bounds = array<i64: 200, 384>}]} {
    %c0 = arith.constant 0 : index
    %c0_0 = arith.constant 0 : index
    %0 = vector.load %arg2[%c0, %c0_0] : memref<200x384xf32, #tpu.memory_space<vmem>>, vector<200x384xf32>
    %c0_1 = arith.constant 0 : index
    %c0_2 = arith.constant 0 : index
    %1 = vector.load %arg3[%c0_1, %c0_2] : memref<384x384xf32, #tpu.memory_space<vmem>>, vector<384x384xf32>
    %cst = arith.constant dense<0.000000e+00> : vector<200x384xf32>
    %2 = tpu.matmul %0, %1, %cst {dimension_numbers = #tpu.dot_dimension_numbers<[1], [0], [0], [1], [0, 0, 1, 1], [], []>} : vector<200x384xf32>, vector<384x384xf32>, vector<200x384xf32> -> vector<200x384xf32>
    %c0_3 = arith.constant 0 : index
    %c0_4 = arith.constant 0 : index
    %3 = vector.load %arg4[%c0_3, %c0_4] : memref<1x384xf32, #tpu.memory_space<vmem>>, vector<1x384xf32>
    %4 = vector.broadcast %3 : vector<1x384xf32> to vector<200x384xf32>
    %5 = arith.addf %2, %4 : vector<200x384xf32>
    %c0_5 = arith.constant 0 : index
    %c0_6 = arith.constant 0 : index
    %6 = vector.load %arg5[%c0_5, %c0_6] : memref<200x384xf32, #tpu.memory_space<vmem>>, vector<200x384xf32>
    tpu.vector_store %arg5[%c0_5, %c0_6], %5 {strides = array<i32>} : memref<200x384xf32, #tpu.memory_space<vmem>>, vector<200x384xf32>,
    return
  }
  func.func @transform_0(%arg0: i32, %arg1: i32) -> (i32, i32) {
    %c0_i32 = arith.constant 0 : i32
    %c0_i32_0 = arith.constant 0 : i32
    return %arg0, %c0_i32 : i32, i32
  }
  func.func @transform_1(%arg0: i32, %arg1: i32) -> (i32, i32) {
    %c0_i32 = arith.constant 0 : i32
    %c0_i32_0 = arith.constant 0 : i32
    return %c0_i32, %arg1 : i32, i32
  }
  func.func @transform_2(%arg0: i32, %arg1: i32) -> (i32, i32) {
    %c0_i32 = arith.constant 0 : i32
    %c0_i32_0 = arith.constant 0 : i32
    return %c0_i32, %arg1 : i32, i32
  }
  func.func @transform_3(%arg0: i32, %arg1: i32) -> (i32, i32) {
    %c0_i32 = arith.constant 0 : i32
    return %arg0, %arg1 : i32, i32
  }
}

</mosaic_0001>

<bundles_post_ra>
// kernel: _pallas_linear.1
= control target key start
LH: loop header
LB: loop body
LE: loop exit
PB: predicated region body
PF: predicated region fallthrough
CT: control target
= control target key end

     0   :  { %v1673_v3 = vmov 0.0|0.0   ;;  %s2551_s0 = inlined_call_operand.vmem [shape: f32[200,384], index: 0, kind: input, shape index: {}]   ;;  %s2552_s1 = inlined_call_operand.vmem [shape: f32[384,320], index: 1, kind: input, shape index: {}]   ;;  %s2553_s2 = inlined_call_operand.vmem [shape: f32[1,320], index: 2, kind: input, shape index: {}]   ;;  %s2554_s3 = inlined_call_operand.hbm [shape: f32[200,320], index: 3, kind: output, shape index: {}]  }
   0x1   :  { %v91_v0 = vld [vmem:[%s2552_s1 + $0x8] sm:$0xff]  ;;  %v94_v1 = vld [vmem:[%s2552_s1 + $0x20] sm:$0xff]  ;;  %v92_v2 = vld [vmem:[%s2552_s1 + $0x10] sm:$0xff]  ;;  %1396 = vmatprep.subr.bf16.mxu1 %v1673_v3 }
   0x2   :  { %v1300_v4 = vpack.c.bf16 %v94_v1, %v91_v0  ;;  %v95_v5 = vld [vmem:[%s2552_s1 + $0x28] sm:$0xff]  ;;  %v90_v6 = vld [vmem:[%s2552_s1] sm:$0xff]  ;;  %v93_v7 = vld [vmem:[%s2552_s1 + $0x18] sm:$0xff] }
   0x3   :  { %v1397_v8 = vpack.c.bf16 %v95_v5, %v92_v2  ;;  %v1302_v9 = vpack.c.bf16 %v93_v7, %v90_v6  ;;  %v97_v10 = vld [vmem:[%s2552_s1 + $0x38] sm:$0xff]  ;;  %v100_v11 = vld [vmem:[%s2552_s1 + $0x50] sm:$0xff]  ;;  %v98_v12 = vld [vmem:[%s2552_s1 + $0x40] sm:$0xff] }
   0x4   :  { %1301 = vmatprep.subr.bf16.mxu0 %v1300_v4  ;;  %v1304_v13 = vpack.c.bf16 %v100_v11, %v97_v10  ;;  %v101_v14 = vld [vmem:[%s2552_s1 + $0x58] sm:$0xff]  ;;  %v96_v15 = vld [vmem:[%s2552_s1 + $0x30] sm:$0xff]  ;;  %v99_v16 = vld [vmem:[%s2552_s1 + $0x48] sm:$0xff] }
   0x5   :  { %1398 = vmatpush1.bf16.msra.mxu1 %v1397_v8  ;;  %1303 = vmatpush1.bf16.msra.mxu0 %v1302_v9  ;;  %v1400_v17 = vpack.c.bf16 %v101_v14, %v98_v12  ;;  %v1306_v18 = vpack.c.bf16 %v99_v16, %v96_v15  ;;  %v103_v19 = vld [vmem:[%s2552_s1 + $0x68] sm:$0xff]  ;;  %v106_v20 = vld [vmem:[%s2552_s1 + $0x80] sm:$0xff]  ;;  %v104_v21 = vld [vmem:[%s2552_s1 + $0x70] sm:$0xff] }
   0x6   :  { %1399 = vmatprep.subr.bf16.mxu1 %v1673_v3  ;;  %1305 = vmatprep.subr.bf16.mxu0 %v1304_v13  ;;  %v1308_v22 = vpack.c.bf16 %v106_v20, %v103_v19  ;;  %v107_v23 = vld [vmem:[%s2552_s1 + $0x88] sm:$0xff]  ;;  %v102_v24 = vld [vmem:[%s2552_s1 + $0x60] sm:$0xff]  ;;  %v105_v25 = vld [vmem:[%s2552_s1 + $0x78] sm:$0xff] }
   0x7   :  { %v109_v26 = vld [vmem:[%s2552_s1 + $0x98] sm:$0xff]  ;;  %v112_v27 = vld [vmem:[%s2552_s1 + $0xb0] sm:$0xff]  ;;  %v1403_v28 = vpack.c.bf16 %v107_v23, %v104_v21  ;;  %v1310_v29 = vpack.c.bf16 %v105_v25, %v102_v24  ;;  %v110_v30 = vld [vmem:[%s2552_s1 + $0xa0] sm:$0xff] }
   0x8   :  { %v1312_v31 = vpack.c.bf16 %v112_v27, %v109_v26  ;;  %v113_v32 = vld [vmem:[%s2552_s1 + $0xb8] sm:$0xff]  ;;  %v108_v33 = vld [vmem:[%s2552_s1 + $0x90] sm:$0xff]  ;;  %v111_v34 = vld [vmem:[%s2552_s1 + $0xa8] sm:$0xff] }
   0x9   :  { %1401 = vmatpush1.bf16.msra.mxu1 %v1400_v17  ;;  %1307 = vmatpush1.bf16.msra.mxu0 %v1306_v18  ;;  %v115_v35 = vld [vmem:[%s2552_s1 + $0xc8] sm:$0xff]  ;;  %v118_v36 = vld [vmem:[%s2552_s1 + $0xe0] sm:$0xff]  ;;  %v1406_v37 = vpack.c.bf16 %v113_v32, %v110_v30  ;;  %v1314_v38 = vpack.c.bf16 %v111_v34, %v108_v33  ;;  %v116_v39 = vld [vmem:[%s2552_s1 + $0xd0] sm:$0xff] }
   0xa   :  { %1402 = vmatprep.subr.bf16.mxu1 %v1673_v3  ;;  %1309 = vmatprep.subr.bf16.mxu0 %v1308_v22  ;;  %v1316_v40 = vpack.c.bf16 %v118_v36, %v115_v35  ;;  %v119_v41 = vld [vmem:[%s2552_s1 + $0xe8] sm:$0xff]  ;;  %v114_v42 = vld [vmem:[%s2552_s1 + $0xc0] sm:$0xff]  ;;  %v117_v43 = vld [vmem:[%s2552_s1 + $0xd8] sm:$0xff] }
   0xb   :  { %v121_v44 = vld [vmem:[%s2552_s1 + $0xf8] sm:$0xff]  ;;  %v124_v45 = vld [vmem:[%s2552_s1 + $0x110] sm:$0xff]  ;;  %v1409_v46 = vpack.c.bf16 %v119_v41, %v116_v39  ;;  %v1318_v47 = vpack.c.bf16 %v117_v43, %v114_v42  ;;  %v122_v48 = vld [vmem:[%s2552_s1 + $0x100] sm:$0xff] }
   0xc   :  { %v1320_v49 = vpack.c.bf16 %v124_v45, %v121_v44  ;;  %v125_v50 = vld [vmem:[%s2552_s1 + $0x118] sm:$0xff]  ;;  %v120_v51 = vld [vmem:[%s2552_s1 + $0xf0] sm:$0xff]  ;;  %v123_v52 = vld [vmem:[%s2552_s1 + $0x108] sm:$0xff] }
   0xd   :  { %1404 = vmatpush1.bf16.msra.mxu1 %v1403_v28  ;;  %1311 = vmatpush1.bf16.msra.mxu0 %v1310_v29  ;;  %v127_v53 = vld [vmem:[%s2552_s1 + $0x128] sm:$0xff]  ;;  %v130_v54 = vld [vmem:[%s2552_s1 + $0x140] sm:$0xff]  ;;  %v1412_v55 = vpack.c.bf16 %v125_v50, %v122_v48  ;;  %v1322_v56 = vpack.c.bf16 %v123_v52, %v120_v51  ;;  %v128_v57 = vld [vmem:[%s2552_s1 + $0x130] sm:$0xff] }
   0xe   :  { %1405 = vmatprep.subr.bf16.mxu1 %v1673_v3  ;;  %1313 = vmatprep.subr.bf16.mxu0 %v1312_v31  ;;  %v1324_v58 = vpack.c.bf16 %v130_v54, %v127_v53  ;;  %v131_v59 = vld [vmem:[%s2552_s1 + $0x148] sm:$0xff]  ;;  %v126_v60 = vld [vmem:[%s2552_s1 + $0x120] sm:$0xff]  ;;  %v129_v61 = vld [vmem:[%s2552_s1 + $0x138] sm:$0xff] }
   0xf   :  { %v133_v62 = vld [vmem:[%s2552_s1 + $0x158] sm:$0xff]  ;;  %v136_v63 = vld [vmem:[%s2552_s1 + $0x170] sm:$0xff]  ;;  %v1415_v0 = vpack.c.bf16 %v131_v59, %v128_v57  ;;  %v1326_v1 = vpack.c.bf16 %v129_v61, %v126_v60  ;;  %v134_v2 = vld [vmem:[%s2552_s1 + $0x160] sm:$0xff] }
  0x10   :  { %v1328_v4 = vpack.c.bf16 %v136_v63, %v133_v62  ;;  %v137_v5 = vld [vmem:[%s2552_s1 + $0x178] sm:$0xff]  ;;  %v132_v6 = vld [vmem:[%s2552_s1 + $0x150] sm:$0xff]  ;;  %v135_v7 = vld [vmem:[%s2552_s1 + $0x168] sm:$0xff] }
  0x11   :  { %1407 = vmatpush1.bf16.msra.mxu1 %v1406_v37  ;;  %1315 = vmatpush1.bf16.msra.mxu0 %v1314_v38  ;;  %v139_v8 = vld [vmem:[%s2552_s1 + $0x188] sm:$0xff]  ;;  %v142_v9 = vld [vmem:[%s2552_s1 + $0x1a0] sm:$0xff]  ;;  %v1418_v10 = vpack.c.bf16 %v137_v5, %v134_v2  ;;  %v1330_v11 = vpack.c.bf16 %v135_v7, %v132_v6  ;;  %v140_v12 = vld [vmem:[%s2552_s1 + $0x190] sm:$0xff] }
  0x12   :  { %1408 = vmatprep.subr.bf16.mxu1 %v1673_v3  ;;  %1317 = vmatprep.subr.bf16.mxu0 %v1316_v40  ;;  %v1332_v13 = vpack.c.bf16 %v142_v9, %v139_v8  ;;  %v143_v14 = vld [vmem:[%s2552_s1 + $0x1a8] sm:$0xff]  ;;  %v138_v15 = vld [vmem:[%s2552_s1 + $0x180] sm:$0xff]  ;;  %v141_v16 = vld [vmem:[%s2552_s1 + $0x198] sm:$0xff] }
  0x13   :  { %v145_v17 = vld [vmem:[%s2552_s1 + $0x1b8] sm:$0xff]  ;;  %v148_v18 = vld [vmem:[%s2552_s1 + $0x1d0] sm:$0xff]  ;;  %v1421_v19 = vpack.c.bf16 %v143_v14, %v140_v12  ;;  %v1334_v20 = vpack.c.bf16 %v141_v16, %v138_v15  ;;  %v146_v21 = vld [vmem:[%s2552_s1 + $0x1c0] sm:$0xff] }
  0x14   :  { %v16_v22 = vld [vmem:[%s2551_s0 + $0x8] sm:$0xff]  ;;  %v1336_v23 = vpack.c.bf16 %v148_v18, %v145_v17  ;;  %v149_v24 = vld [vmem:[%s2552_s1 + $0x1d8] sm:$0xff]  ;;  %v144_v25 = vld [vmem:[%s2552_s1 + $0x1b0] sm:$0xff] }
  0x15   :  { %1410 = vmatpush1.bf16.msra.mxu1 %v1409_v46  ;;  %1319 = vmatpush1.bf16.msra.mxu0 %v1318_v47  ;;  %v147_v26 = vld [vmem:[%s2552_s1 + $0x1c8] sm:$0xff]  ;;  %v154_v28 = vld [vmem:[%s2552_s1 + $0x200] sm:$0xff]  ;;  %v1424_v29 = vpack.c.bf16 %v149_v24, %v146_v21  ;;  %v152_v31 = vld [vmem:[%s2552_s1 + $0x1f0] sm:$0xff] }
  0x16   :  { %1411 = vmatprep.subr.bf16.mxu1 %v1673_v3  ;;  %1321 = vmatprep.subr.bf16.mxu0 %v1320_v49  ;;  %v151_v27 = vld [vmem:[%s2552_s1 + $0x1e8] sm:$0xff]  ;;  %v1338_v30 = vpack.c.bf16 %v147_v26, %v144_v25  ;;  %v150_v34 = vld [vmem:[%s2552_s1 + $0x1e0] sm:$0xff]  ;;  %v153_v35 = vld [vmem:[%s2552_s1 + $0x1f8] sm:$0xff] }
  0x17   :  { %745 = vmatprep.mubr.f32.mxu1 %v16_v22  ;;  %315 = vmatprep.mubr.f32.mxu0 %v16_v22  ;;  %v1340_v32 = vpack.c.bf16 %v154_v28, %v151_v27  ;;  %v155_v33 = vld [vmem:[%s2552_s1 + $0x208] sm:$0xff]  ;;  %v157_v36 = vld [vmem:[%s2552_s1 + $0x218] sm:$0xff]  ;;  %v160_v37 = vld [vmem:[%s2552_s1 + $0x230] sm:$0xff]  ;;  %v1342_v39 = vpack.c.bf16 %v153_v35, %v150_v34 }
  0x18   :  { %v1427_v38 = vpack.c.bf16 %v155_v33, %v152_v31  ;;  %v158_v40 = vld [vmem:[%s2552_s1 + $0x220] sm:$0xff]  ;;  %v1344_v41 = vpack.c.bf16 %v160_v37, %v157_v36  ;;  %v161_v42 = vld [vmem:[%s2552_s1 + $0x238] sm:$0xff]  ;;  %v156_v43 = vld [vmem:[%s2552_s1 + $0x210] sm:$0xff] }
  0x19   :  { %1413 = vmatpush1.bf16.msra.mxu1 %v1412_v55  ;;  %1323 = vmatpush1.bf16.msra.mxu0 %v1322_v56  ;;  %v159_v44 = vld [vmem:[%s2552_s1 + $0x228] sm:$0xff]  ;;  %v166_v46 = vld [vmem:[%s2552_s1 + $0x260] sm:$0xff]  ;;  %v1430_v47 = vpack.c.bf16 %v161_v42, %v158_v40  ;;  %v164_v49 = vld [vmem:[%s2552_s1 + $0x250] sm:$0xff] }
  0x1a   :  { %1414 = vmatprep.subr.bf16.mxu1 %v1673_v3  ;;  %1325 = vmatprep.subr.bf16.mxu0 %v1324_v58  ;;  %v163_v45 = vld [vmem:[%s2552_s1 + $0x248] sm:$0xff]  ;;  %v1346_v48 = vpack.c.bf16 %v159_v44, %v156_v43  ;;  %v162_v52 = vld [vmem:[%s2552_s1 + $0x240] sm:$0xff]  ;;  %v165_v53 = vld [vmem:[%s2552_s1 + $0x258] sm:$0xff] }
  0x1b   :  { %v1348_v50 = vpack.c.bf16 %v166_v46, %v163_v45  ;;  %v167_v51 = vld [vmem:[%s2552_s1 + $0x268] sm:$0xff]  ;;  %v169_v54 = vld [vmem:[%s2552_s1 + $0x278] sm:$0xff]  ;;  %v172_v55 = vld [vmem:[%s2552_s1 + $0x290] sm:$0xff]  ;;  %v1350_v57 = vpack.c.bf16 %v165_v53, %v162_v52 }
  0x1c   :  { %v1433_v56 = vpack.c.bf16 %v167_v51, %v164_v49  ;;  %v170_v58 = vld [vmem:[%s2552_s1 + $0x280] sm:$0xff]  ;;  %v1352_v59 = vpack.c.bf16 %v172_v55, %v169_v54  ;;  %v173_v60 = vld [vmem:[%s2552_s1 + $0x298] sm:$0xff]  ;;  %v168_v61 = vld [vmem:[%s2552_s1 + $0x270] sm:$0xff] }
  0x1d   :  { %1416 = vmatpush1.bf16.msra.mxu1 %v1415_v0  ;;  %1327 = vmatpush1.bf16.msra.mxu0 %v1326_v1  ;;  %v171_v62 = vld [vmem:[%s2552_s1 + $0x288] sm:$0xff]  ;;  %v178_v0 = vld [vmem:[%s2552_s1 + $0x2c0] sm:$0xff]  ;;  %v1436_v1 = vpack.c.bf16 %v173_v60, %v170_v58  ;;  %v177_v8 = vld [vmem:[%s2552_s1 + $0x2b8] sm:$0xff] }
  0x1e   :  { %1417 = vmatprep.subr.bf16.mxu1 %v1673_v3  ;;  %1329 = vmatprep.subr.bf16.mxu0 %v1328_v4  ;;  %v175_v63 = vld [vmem:[%s2552_s1 + $0x2a8] sm:$0xff]  ;;  %v1354_v2 = vpack.c.bf16 %v171_v62, %v168_v61  ;;  %v176_v4 = vld [vmem:[%s2552_s1 + $0x2b0] sm:$0xff]  ;;  %v174_v7 = vld [vmem:[%s2552_s1 + $0x2a0] sm:$0xff] }
  0x1f   :  { %v1356_v5 = vpack.c.bf16 %v178_v0, %v175_v63  ;;  %v179_v6 = vld [vmem:[%s2552_s1 + $0x2c8] sm:$0xff]  ;;  %v181_v9 = vld [vmem:[%s2552_s1 + $0x2d8] sm:$0xff]  ;;  %v1358_v12 = vpack.c.bf16 %v177_v8, %v174_v7  ;;  %v180_v16 = vld [vmem:[%s2552_s1 + $0x2d0] sm:$0xff] }
  0x20   :  { %v185_v15 = vld [vmem:[%s2552_s1 + $0x2f8] sm:$0xff]  ;;  %v183_v17 = vld [vmem:[%s2552_s1 + $0x2e8] sm:$0xff]  ;;  %v188_v25 = vld [vmem:[%s2552_s1 + $0x310] sm:$0xff] }
  0x21   :  { %1419 = vmatpush1.bf16.msra.mxu1 %v1418_v10  ;;  %1331 = vmatpush1.bf16.msra.mxu0 %v1330_v11  ;;  %v184_v10 = vld [vmem:[%s2552_s1 + $0x2f0] sm:$0xff]  ;;  %v1439_v11 = vpack.c.bf16 %v179_v6, %v176_v4  ;;  %v187_v18 = vld [vmem:[%s2552_s1 + $0x308] sm:$0xff]  ;;  %v1362_v21 = vpack.c.bf16 %v183_v17, %v180_v16  ;;  %v189_v24 = vld [vmem:[%s2552_s1 + $0x318] sm:$0xff] }
  0x22   :  { %1420 = vmatprep.subr.bf16.mxu1 %v1673_v3  ;;  %1333 = vmatprep.subr.bf16.mxu0 %v1332_v13  ;;  %v182_v13 = vld [vmem:[%s2552_s1 + $0x2e0] sm:$0xff]  ;;  %v1360_v14 = vpack.c.bf16 %v184_v10, %v181_v9  ;;  %v191_v26 = vld [vmem:[%s2552_s1 + $0x328] sm:$0xff]  ;;  %v193_v27 = vld [vmem:[%s2552_s1 + $0x338] sm:$0xff] }
  0x23   :  { %v196_v28 = vld [vmem:[%s2552_s1 + $0x350] sm:$0xff]  ;;  %v19_v31 = vld [vmem:[%s2551_s0 + $0x20] sm:$0xff]  ;;  %v195_v35 = vld [vmem:[%s2552_s1 + $0x348] sm:$0xff] }
  0x24   :  { %v192_v33 = vld [vmem:[%s2552_s1 + $0x330] sm:$0xff]  ;;  %v1368_v34 = vpack.c.bf16 %v196_v28, %v193_v27  ;;  %v194_v36 = vld [vmem:[%s2552_s1 + $0x340] sm:$0xff]  ;;  %v197_v37 = vld [vmem:[%s2552_s1 + $0x358] sm:$0xff] }
  0x25   :  { %1422 = vmatpush1.bf16.msra.mxu1 %v1421_v19  ;;  %1335 = vmatpush1.bf16.msra.mxu0 %v1334_v20  ;;  %v190_v19 = vld [vmem:[%s2552_s1 + $0x320] sm:$0xff]  ;;  %v1442_v20 = vpack.c.bf16 %v185_v15, %v182_v13 }
  0x26   :  { %1423 = vmatprep.subr.bf16.mxu1 %v1673_v3  ;;  %1337 = vmatprep.subr.bf16.mxu0 %v1336_v23  ;;  %v1364_v22 = vpack.c.bf16 %v190_v19, %v187_v18  ;;  %v186_v23 = vld [vmem:[%s2552_s1 + $0x300] sm:$0xff] }
  0x29   :  { %1425 = vmatpush1.bf16.msra.mxu1 %v1424_v29  ;;  %1339 = vmatpush1.bf16.msra.mxu0 %v1338_v30  ;;  %v15_v29 = vld [vmem:[%s2551_s0] sm:$0xff]  ;;  %v1366_v30 = vpack.c.bf16 %v189_v24, %v186_v23 }
  0x2a   :  { %1426 = vmatprep.subr.bf16.mxu1 %v1673_v3  ;;  %1341 = vmatprep.subr.bf16.mxu0 %v1340_v32  ;;  %v1445_v32 = vpack.c.bf16 %v191_v26, %v188_v25 }
  0x2d   :  { %1428 = vmatpush1.bf16.msra.mxu1 %v1427_v38  ;;  %1343 = vmatpush1.bf16.msra.mxu0 %v1342_v39  ;;  %v199_v38 = vld [vmem:[%s2552_s1 + $0x368] sm:$0xff]  ;;  %v202_v39 = vld [vmem:[%s2552_s1 + $0x380] sm:$0xff] }
  0x2e   :  { %1429 = vmatprep.subr.bf16.mxu1 %v1673_v3  ;;  %1345 = vmatprep.subr.bf16.mxu0 %v1344_v41 }
  0x31   :  { %1431 = vmatpush1.bf16.msra.mxu1 %v1430_v47  ;;  %1347 = vmatpush1.bf16.msra.mxu0 %v1346_v48 }
  0x32   :  { %1432 = vmatprep.subr.bf16.mxu1 %v1673_v3  ;;  %1349 = vmatprep.subr.bf16.mxu0 %v1348_v50 }
  0x35   :  { %1434 = vmatpush1.bf16.msra.mxu1 %v1433_v56  ;;  %1351 = vmatpush1.bf16.msra.mxu0 %v1350_v57 }
  0x36   :  { %1435 = vmatprep.subr.bf16.mxu1 %v1673_v3  ;;  %1353 = vmatprep.subr.bf16.mxu0 %v1352_v59 }
  0x39   :  { %1437 = vmatpush1.bf16.msra.mxu1 %v1436_v1  ;;  %1355 = vmatpush1.bf16.msra.mxu0 %v1354_v2 }
  0x3a   :  { %1438 = vmatprep.subr.bf16.mxu1 %v1673_v3  ;;  %1357 = vmatprep.subr.bf16.mxu0 %v1356_v5 }
  0x3d   :  { %1440 = vmatpush1.bf16.msra.mxu1 %v1439_v11  ;;  %1359 = vmatpush1.bf16.msra.mxu0 %v1358_v12 }
  0x3e   :  { %1441 = vmatprep.subr.bf16.mxu1 %v1673_v3  ;;  %1361 = vmatprep.subr.bf16.mxu0 %v1360_v14 }
  0x41   :  { %1443 = vmatpush1.bf16.msra.mxu1 %v1442_v20  ;;  %1363 = vmatpush1.bf16.msra.mxu0 %v1362_v21 }
  0x42   :  { %1365 = vmatprep.subr.bf16.mxu0 %v1364_v22  ;;  %1444 = vmatprep.subr.bf16.mxu1 %v1673_v3 }
  0x44   :  { %746 = vmatmul.mubr.f32.vlgmr.msra.gmra.mrb[0].mxu1 %v15_v29  ;;  %316 = vmatmul.mubr.f32.vlgmr.msra.gmra.mrb[0].mxu0 %v15_v29 }
  0x45   :  { %8 = vsyncpa [#allocation3], 0  ;;  %1367 = vmatpush1.bf16.msra.mxu0 %v1366_v30  ;;  %750 = vmatprep.mubr.f32.mxu1 %v19_v31  ;;  %v18_v40 = vld [vmem:[%s2551_s0 + $0x18] sm:$0xff]  ;;  %v1370_v42 = vpack.c.bf16 %v195_v35, %v192_v33  ;;  %v1448_v43 = vpack.c.bf16 %v197_v37, %v194_v36  ;;  %v198_v44 = vld [vmem:[%s2552_s1 + $0x360] sm:$0xff]  ;;  %v1372_v45 = vpack.c.bf16 %v202_v39, %v199_v38  ;;  %vm1674_vm0 = vmmov 0  }
  0x46   :  { %1446 = vmatpush3.bf16.msra.mxu1 %v1445_v32  ;;  %321 = vmatprep.mubr.f32.mxu0 %v19_v31  ;;  %v22_v41 = vld [vmem:[%s2551_s0 + $0x38] sm:$0xff]  ;;  %v200_v47 = vld [vmem:[%s2552_s1 + $0x370] sm:$0xff]  ;;  %v203_v48 = vld [vmem:[%s2552_s1 + $0x388] sm:$0xff] }
  0x47   :  { %1369 = vmatprep.subr.bf16.mxu0 %v1368_v34  ;;  %1447 = vmatprep.subr.bf16.mxu1 %v1673_v3  ;;  %v201_v46 = vld [vmem:[%s2552_s1 + $0x378] sm:$0xff]  ;;  %v208_v50 = vld [vmem:[%s2552_s1 + $0x3b0] sm:$0xff]  ;;  %v1451_v54 = vpack.c.bf16 %v203_v48, %v200_v47  ;;  %v207_v57 = vld [vmem:[%s2552_s1 + $0x3a8] sm:$0xff] }
  0x48   :  { %751 = vmatmul.mubr.f32.gmra.mrb[2].mxu1 %v18_v40  ;;  %322 = vmatmul.mubr.f32.gmra.mrb[2].mxu0 %v18_v40  ;;  %v205_v49 = vld [vmem:[%s2552_s1 + $0x398] sm:$0xff]  ;;  %v21_v51 = vld [vmem:[%s2551_s0 + $0x30] sm:$0xff]  ;;  %v1374_v53 = vpack.c.bf16 %v201_v46, %v198_v44  ;;  %v206_v58 = vld [vmem:[%s2552_s1 + $0x3a0] sm:$0xff] }
  0x49   :  { %755 = vmatprep.mubr.f32.mxu1 %v22_v41  ;;  %327 = vmatprep.mubr.f32.mxu0 %v22_v41  ;;  %v25_v52 = vld [vmem:[%s2551_s0 + $0x50] sm:$0xff]  ;;  %v1376_v56 = vpack.c.bf16 %v208_v50, %v205_v49  ;;  %v209_v59 = vld [vmem:[%s2552_s1 + $0x3b8] sm:$0xff]  ;;  %v211_v60 = vld [vmem:[%s2552_s1 + $0x3c8] sm:$0xff] }
  0x4a   :  { %1371 = vmatpush1.bf16.msra.mxu0 %v1370_v42  ;;  %1449 = vmatpush3.bf16.msra.mxu1 %v1448_v43  ;;  %v204_v55 = vld [vmem:[%s2552_s1 + $0x390] sm:$0xff]  ;;  %v214_v61 = vld [vmem:[%s2552_s1 + $0x3e0] sm:$0xff]  ;;  %v24_v62 = vld [vmem:[%s2551_s0 + $0x48] sm:$0xff]  ;;  %v1454_v1 = vpack.c.bf16 %v209_v59, %v206_v58 }
  0x4b   :  { %1373 = vmatprep.subr.bf16.mxu0 %v1372_v45  ;;  %1450 = vmatprep.subr.bf16.mxu1 %v1673_v3  ;;  %v28_v63 = vld [vmem:[%s2551_s0 + $0x68] sm:$0xff]  ;;  %v1378_v0 = vpack.c.bf16 %v207_v57, %v204_v55  ;;  %v210_v2 = vld [vmem:[%s2552_s1 + $0x3c0] sm:$0xff]  ;;  %v1380_v4 = vpack.c.bf16 %v214_v61, %v211_v60  ;;  %v213_v5 = vld [vmem:[%s2552_s1 + $0x3d8] sm:$0xff] }
  0x4c   :  { %756 = vmatmul.mubr.f32.gmra.mrb[4].mxu1 %v21_v51  ;;  %328 = vmatmul.mubr.f32.gmra.mrb[4].mxu0 %v21_v51  ;;  %v212_v6 = vld [vmem:[%s2552_s1 + $0x3d0] sm:$0xff]  ;;  %v215_v7 = vld [vmem:[%s2552_s1 + $0x3e8] sm:$0xff]  ;;  %v217_v8 = vld [vmem:[%s2552_s1 + $0x3f8] sm:$0xff]  ;;  %v1382_v12 = vpack.c.bf16 %v213_v5, %v210_v2 }
  0x4d   :  { %760 = vmatprep.mubr.f32.mxu1 %v25_v52  ;;  %333 = vmatprep.mubr.f32.mxu0 %v25_v52  ;;  %v220_v9 = vld [vmem:[%s2552_s1 + $0x410] sm:$0xff]  ;;  %v27_v10 = vld [vmem:[%s2551_s0 + $0x60] sm:$0xff]  ;;  %v1457_v13 = vpack.c.bf16 %v215_v7, %v212_v6  ;;  %v219_v16 = vld [vmem:[%s2552_s1 + $0x408] sm:$0xff] }
  0x4e   :  { %1375 = vmatpush1.bf16.msra.mxu0 %v1374_v53  ;;  %1452 = vmatpush3.bf16.msra.mxu1 %v1451_v54  ;;  %v31_v11 = vld [vmem:[%s2551_s0 + $0x80] sm:$0xff]  ;;  %v216_v14 = vld [vmem:[%s2552_s1 + $0x3f0] sm:$0xff]  ;;  %v1384_v15 = vpack.c.bf16 %v220_v9, %v217_v8  ;;  %v221_v18 = vld [vmem:[%s2552_s1 + $0x418] sm:$0xff] }
  0x4f   :  { %1377 = vmatprep.subr.bf16.mxu0 %v1376_v56  ;;  %1453 = vmatprep.subr.bf16.mxu1 %v1673_v3  ;;  %v218_v17 = vld [vmem:[%s2552_s1 + $0x400] sm:$0xff]  ;;  %v223_v19 = vld [vmem:[%s2552_s1 + $0x428] sm:$0xff]  ;;  %v30_v21 = vld [vmem:[%s2551_s0 + $0x78] sm:$0xff]  ;;  %v1386_v23 = vpack.c.bf16 %v219_v16, %v216_v14  ;;  %v1675_v14 = vmov 0.0  }
  0x50   :  { %761 = vmatmul.mubr.f32.gmra.mrb[6].mxu1 %v24_v62  ;;  %334 = vmatmul.mubr.f32.gmra.mrb[6].mxu0 %v24_v62  ;;  %v226_v20 = vld [vmem:[%s2552_s1 + $0x440] sm:$0xff]  ;;  %v34_v22 = vld [vmem:[%s2551_s0 + $0x98] sm:$0xff]  ;;  %v1460_v24 = vpack.c.bf16 %v221_v18, %v218_v17  ;;  %v224_v28 = vld [vmem:[%s2552_s1 + $0x430] sm:$0xff] }
  0x51   :  { %765 = vmatprep.mubr.f32.mxu1 %v28_v63  ;;  %339 = vmatprep.mubr.f32.mxu0 %v28_v63  ;;  %v222_v25 = vld [vmem:[%s2552_s1 + $0x420] sm:$0xff]  ;;  %v1388_v26 = vpack.c.bf16 %v226_v20, %v223_v19  ;;  %v225_v27 = vld [vmem:[%s2552_s1 + $0x438] sm:$0xff]  ;;  %v227_v29 = vld [vmem:[%s2552_s1 + $0x448] sm:$0xff] }
  0x52   :  { %1379 = vmatpush1.bf16.msra.mxu0 %v1378_v0  ;;  %1455 = vmatpush3.bf16.msra.mxu1 %v1454_v1  ;;  %v229_v30 = vld [vmem:[%s2552_s1 + $0x458] sm:$0xff]  ;;  %v232_v31 = vld [vmem:[%s2552_s1 + $0x470] sm:$0xff]  ;;  %v1390_v34 = vpack.c.bf16 %v225_v27, %v222_v25  ;;  %v1463_v35 = vpack.c.bf16 %v227_v29, %v224_v28  ;;  %v231_v38 = vld [vmem:[%s2552_s1 + $0x468] sm:$0xff] }
  0x53   :  { %1381 = vmatprep.subr.bf16.mxu0 %v1380_v4  ;;  %1456 = vmatprep.subr.bf16.mxu1 %v1673_v3  ;;  %v33_v32 = vld [vmem:[%s2551_s0 + $0x90] sm:$0xff]  ;;  %v1392_v37 = vpack.c.bf16 %v232_v31, %v229_v30  ;;  %v230_v39 = vld [vmem:[%s2552_s1 + $0x460] sm:$0xff]  ;;  %v233_v40 = vld [vmem:[%s2552_s1 + $0x478] sm:$0xff] }
  0x54   :  { %766 = vmatmul.mubr.f32.gmra.mrb[8].mxu1 %v27_v10  ;;  %340 = vmatmul.mubr.f32.gmra.mrb[8].mxu0 %v27_v10  ;;  %v37_v33 = vld [vmem:[%s2551_s0 + $0xb0] sm:$0xff]  ;;  %v36_v41 = vld [vmem:[%s2551_s0 + $0xa8] sm:$0xff]  ;;  %v1466_v44 = vpack.c.bf16 %v233_v40, %v230_v39  ;;  %v39_v45 = vld [vmem:[%s2551_s0 + $0xc0] sm:$0xff]  ;;  %v236_v40 = vlaneseq }
  0x55   :  { %770 = vmatprep.mubr.f32.mxu1 %v31_v11  ;;  %345 = vmatprep.mubr.f32.mxu0 %v31_v11  ;;  %v228_v36 = vld [vmem:[%s2552_s1 + $0x450] sm:$0xff]  ;;  %v40_v42 = vld [vmem:[%s2551_s0 + $0xc8] sm:$0xff]  ;;  %v43_v46 = vld [vmem:[%s2551_s0 + $0xe0] sm:$0xff] }
  0x56   :  { %1383 = vmatpush1.bf16.msra.mxu0 %v1382_v12  ;;  %1458 = vmatpush3.bf16.msra.mxu1 %v1457_v13  ;;  %v1394_v43 = vpack.c.bf16 %v231_v38, %v228_v36  ;;  %v46_v47 = vld [vmem:[%s2551_s0 + $0xf8] sm:$0xff]  ;;  %v45_v48 = vld [vmem:[%s2551_s0 + $0xf0] sm:$0xff]  ;;  %v48_v50 = vld [vmem:[%s2551_s0 + $0x108] sm:$0xff] }
  0x57   :  { %1385 = vmatprep.subr.bf16.mxu0 %v1384_v15  ;;  %1459 = vmatprep.subr.bf16.mxu1 %v1673_v3  ;;  %v49_v49 = vld [vmem:[%s2551_s0 + $0x110] sm:$0xff]  ;;  %v52_v51 = vld [vmem:[%s2551_s0 + $0x128] sm:$0xff]  ;;  %v51_v52 = vld [vmem:[%s2551_s0 + $0x120] sm:$0xff] }
  0x58   :  { %771 = vmatmul.mubr.f32.gmra.mrb[10].mxu1 %v30_v21  ;;  %346 = vmatmul.mubr.f32.gmra.mrb[10].mxu0 %v30_v21  ;;  %v55_v53 = vld [vmem:[%s2551_s0 + $0x140] sm:$0xff]  ;;  %v54_v54 = vld [vmem:[%s2551_s0 + $0x138] sm:$0xff]  ;;  %v57_v56 = vld [vmem:[%s2551_s0 + $0x150] sm:$0xff] }
  0x59   :  { %775 = vmatprep.mubr.f32.mxu1 %v34_v22  ;;  %351 = vmatprep.mubr.f32.mxu0 %v34_v22  ;;  %v58_v55 = vld [vmem:[%s2551_s0 + $0x158] sm:$0xff]  ;;  %v61_v57 = vld [vmem:[%s2551_s0 + $0x170] sm:$0xff]  ;;  %v60_v58 = vld [vmem:[%s2551_s0 + $0x168] sm:$0xff] }
  0x5a   :  { %1387 = vmatpush1.bf16.msra.mxu0 %v1386_v23  ;;  %1461 = vmatpush3.bf16.msra.mxu1 %v1460_v24  ;;  %v64_v59 = vld [vmem:[%s2551_s0 + $0x188] sm:$0xff]  ;;  %v63_v60 = vld [vmem:[%s2551_s0 + $0x180] sm:$0xff]  ;;  %v66_v62 = vld [vmem:[%s2551_s0 + $0x198] sm:$0xff] }
  0x5b   :  { %1389 = vmatprep.subr.bf16.mxu0 %v1388_v26  ;;  %1462 = vmatprep.subr.bf16.mxu1 %v1673_v3  ;;  %v67_v61 = vld [vmem:[%s2551_s0 + $0x1a0] sm:$0xff]  ;;  %v70_v63 = vld [vmem:[%s2551_s0 + $0x1b8] sm:$0xff]  ;;  %v69_v0 = vld [vmem:[%s2551_s0 + $0x1b0] sm:$0xff] }
  0x5c   :  { %776 = vmatmul.mubr.f32.gmra.mrb[12].mxu1 %v33_v32  ;;  %352 = vmatmul.mubr.f32.gmra.mrb[12].mxu0 %v33_v32  ;;  %v73_v1 = vld [vmem:[%s2551_s0 + $0x1d0] sm:$0xff]  ;;  %v72_v2 = vld [vmem:[%s2551_s0 + $0x1c8] sm:$0xff]  ;;  %v75_v5 = vld [vmem:[%s2551_s0 + $0x1e0] sm:$0xff] }
  0x5d   :  { %780 = vmatprep.mubr.f32.mxu1 %v37_v33  ;;  %357 = vmatprep.mubr.f32.mxu0 %v37_v33  ;;  %v76_v4 = vld [vmem:[%s2551_s0 + $0x1e8] sm:$0xff]  ;;  %v79_v6 = vld [vmem:[%s2551_s0 + $0x200] sm:$0xff]  ;;  %v78_v7 = vld [vmem:[%s2551_s0 + $0x1f8] sm:$0xff] }
  0x5e   :  { %1391 = vmatpush1.bf16.msra.mxu0 %v1390_v34  ;;  %1464 = vmatpush3.bf16.msra.mxu1 %v1463_v35  ;;  %v82_v8 = vld [vmem:[%s2551_s0 + $0x218] sm:$0xff]  ;;  %v81_v9 = vld [vmem:[%s2551_s0 + $0x210] sm:$0xff]  ;;  %v84_v11 = vld [vmem:[%s2551_s0 + $0x228] sm:$0xff] }
  0x5f   :  { %1393 = vmatprep.subr.bf16.mxu0 %v1392_v37  ;;  %1465 = vmatprep.subr.bf16.mxu1 %v1673_v3  ;;  %v42_v3 = vld [vmem:[%s2551_s0 + $0xd8] sm:$0xff]  ;;  %v85_v10 = vld [vmem:[%s2551_s0 + $0x230] sm:$0xff]  ;;  %v88_v12 = vld [vmem:[%s2551_s0 + $0x248] sm:$0xff] }
  0x60   :  { %781 = vmatmul.mubr.f32.gmra.mrb[14].mxu1 %v36_v41  ;;  %358 = vmatmul.mubr.f32.gmra.mrb[14].mxu0 %v36_v41  ;;  %v87_v13 = vld [vmem:[%s2551_s0 + $0x240] sm:$0xff]  ;;  %v17_v15 = vld [vmem:[%s2551_s0 + $0x10] sm:$0xff]  ;;  %v20_v16 = vld [vmem:[%s2551_s0 + $0x28] sm:$0xff]  ;;  %v237_v41 = vshrl.u32 %v236_v40, 7 }
  0x61   :  { %785 = vmatprep.mubr.f32.mxu1 %v40_v42  ;;  %363 = vmatprep.mubr.f32.mxu0 %v40_v42  ;;  %v23_v17 = vld [vmem:[%s2551_s0 + $0x40] sm:$0xff]  ;;  %v26_v18 = vld [vmem:[%s2551_s0 + $0x58] sm:$0xff]  ;;  %v29_v19 = vld [vmem:[%s2551_s0 + $0x70] sm:$0xff] }
  0x62   :  { %1395 = vmatpush1.bf16.msra.mxu0 %v1394_v43  ;;  %1467 = vmatpush3.bf16.msra.mxu1 %v1466_v44  ;;  %v32_v20 = vld [vmem:[%s2551_s0 + $0x88] sm:$0xff]  ;;  %v35_v21 = vld [vmem:[%s2551_s0 + $0xa0] sm:$0xff]  ;;  %v38_v22 = vld [vmem:[%s2551_s0 + $0xb8] sm:$0xff]  ;;  %v246_v42 = vsub.s32 2, %v237_v41  ;;  %v238_v43 = vsub.s32 0, %v237_v41 }
  0x63   :  { %v41_v23 = vld [vmem:[%s2551_s0 + $0xd0] sm:$0xff]  ;;  %v44_v24 = vld [vmem:[%s2551_s0 + $0xe8] sm:$0xff]  ;;  %v47_v25 = vld [vmem:[%s2551_s0 + $0x100] sm:$0xff] }
  0x64   :  { %786 = vmatmul.mubr.f32.gmra.mrb[16].mxu1 %v39_v45  ;;  %364 = vmatmul.mubr.f32.gmra.mrb[16].mxu0 %v39_v45  ;;  %v50_v26 = vld [vmem:[%s2551_s0 + $0x118] sm:$0xff]  ;;  %v53_v27 = vld [vmem:[%s2551_s0 + $0x130] sm:$0xff]  ;;  %v56_v28 = vld [vmem:[%s2551_s0 + $0x148] sm:$0xff]  ;;  %v242_v45 = vsub.s32 1, %v237_v41 }
  0x65   :  { %790 = vmatprep.mubr.f32.mxu1 %v43_v46  ;;  %369 = vmatprep.mubr.f32.mxu0 %v43_v46  ;;  %v59_v29 = vld [vmem:[%s2551_s0 + $0x160] sm:$0xff]  ;;  %v62_v30 = vld [vmem:[%s2551_s0 + $0x178] sm:$0xff]  ;;  %v65_v31 = vld [vmem:[%s2551_s0 + $0x190] sm:$0xff] }
  0x66   :  { %v68_v32 = vld [vmem:[%s2551_s0 + $0x1a8] sm:$0xff]  ;;  %v71_v33 = vld [vmem:[%s2551_s0 + $0x1c0] sm:$0xff]  ;;  %v74_v34 = vld [vmem:[%s2551_s0 + $0x1d8] sm:$0xff] }
  0x67   :  { %v77_v35 = vld [vmem:[%s2551_s0 + $0x1f0] sm:$0xff]  ;;  %v80_v36 = vld [vmem:[%s2551_s0 + $0x208] sm:$0xff]  ;;  %v83_v37 = vld [vmem:[%s2551_s0 + $0x220] sm:$0xff] }
  0x68   :  { %791 = vmatmul.mubr.f32.gmra.mrb[18].mxu1 %v42_v3  ;;  %370 = vmatmul.mubr.f32.gmra.mrb[18].mxu0 %v42_v3  ;;  %v86_v38 = vld [vmem:[%s2551_s0 + $0x238] sm:$0xff]  ;;  %v89_v39 = vld [vmem:[%s2551_s0 + $0x250] sm:$0xff]  ;;  %v234_v44 = vld [vmem:[%s2553_s2] sm:$0x7]  ;;  %s1676_s0 = smov [#allocation2]  }
  0x69   :  { %795 = vmatprep.mubr.f32.mxu1 %v46_v47  ;;  %375 = vmatprep.mubr.f32.mxu0 %v46_v47  ;;  %v2458_v46 = vrot.slane %v234_v44, %v246_v42  ;;  %v2460_v3 = vrot.slane %v234_v44, %v238_v43  ;;  %v2462_v47 = vrot.slane %v234_v44, %v242_v45  ;;  %s1141_s2 = sshll.u32 %s1676_s0, 4  ;;  %s1142_s2 = int_to_ptr.vmem [resolvable:$true] %s1141_s2 }
  0x6a   :  { %s1649_s15 = scalar_lea.vmem %s1142_s2, 9600  ;;  %p1654_p1 = scmp.lt.s32.totalorder %s1142_s2, %s1142_s2 }
  0x6b   :  { %p1650_p0 = scmp.ne.s32.totalorder %s1142_s2, %s1649_s15  ;;  %p1655_p2 = scmp.lt.s32.totalorder %s1649_s15, %s1649_s15 }
  0x6c   :  { %796 = vmatmul.mubr.f32.gmra.mrb[20].mxu1 %v45_v48  ;;  %376 = vmatmul.mubr.f32.gmra.mrb[20].mxu0 %v45_v48 }
  0x6d   :  { %800 = vmatprep.mubr.f32.mxu1 %v49_v49  ;;  %381 = vmatprep.mubr.f32.mxu0 %v49_v49  ;;  %p1656_p3 = por %p1655_p2, %p1654_p1 }
  0x6f   :  { %p1657_p4 = pnand %p1656_p3, %p1650_p0 }
  0x70   :  { %801 = vmatmul.mubr.f32.gmra.mrb[22].mxu1 %v48_v50  ;;  %382 = vmatmul.mubr.f32.gmra.mrb[22].mxu0 %v48_v50 }
  0x71   :  { %805 = vmatprep.mubr.f32.mxu1 %v52_v51  ;;  %387 = vmatprep.mubr.f32.mxu0 %v52_v51 }
  0x74   :  { %806 = vmatmul.mubr.f32.gmra.mrb[24].mxu1 %v51_v52  ;;  %388 = vmatmul.mubr.f32.gmra.mrb[24].mxu0 %v51_v52 }
  0x75   :  { %810 = vmatprep.mubr.f32.mxu1 %v55_v53  ;;  %393 = vmatprep.mubr.f32.mxu0 %v55_v53 }
  0x78   :  { %811 = vmatmul.mubr.f32.gmra.mrb[26].mxu1 %v54_v54  ;;  %394 = vmatmul.mubr.f32.gmra.mrb[26].mxu0 %v54_v54 }
  0x79   :  { %815 = vmatprep.mubr.f32.mxu1 %v58_v55  ;;  %399 = vmatprep.mubr.f32.mxu0 %v58_v55 }
  0x7c   :  { %816 = vmatmul.mubr.f32.gmra.mrb[28].mxu1 %v57_v56  ;;  %400 = vmatmul.mubr.f32.gmra.mrb[28].mxu0 %v57_v56 }
  0x7d   :  { %820 = vmatprep.mubr.f32.mxu1 %v61_v57  ;;  %405 = vmatprep.mubr.f32.mxu0 %v61_v57 }
  0x80   :  { %821 = vmatmul.mubr.f32.gmra.mrb[30].mxu1 %v60_v58  ;;  %406 = vmatmul.mubr.f32.gmra.mrb[30].mxu0 %v60_v58 }
  0x81   :  { %825 = vmatprep.mubr.f32.mxu1 %v64_v59  ;;  %411 = vmatprep.mubr.f32.mxu0 %v64_v59 }
  0x84   :  { %826 = vmatmul.mubr.f32.gmra.mrb[32].mxu1 %v63_v60  ;;  %412 = vmatmul.mubr.f32.gmra.mrb[32].mxu0 %v63_v60 }
  0x85   :  { %830 = vmatprep.mubr.f32.mxu1 %v67_v61  ;;  %417 = vmatprep.mubr.f32.mxu0 %v67_v61 }
  0x88   :  { %831 = vmatmul.mubr.f32.gmra.mrb[34].mxu1 %v66_v62  ;;  %418 = vmatmul.mubr.f32.gmra.mrb[34].mxu0 %v66_v62 }
  0x89   :  { %835 = vmatprep.mubr.f32.mxu1 %v70_v63  ;;  %423 = vmatprep.mubr.f32.mxu0 %v70_v63 }
  0x8c   :  { %836 = vmatmul.mubr.f32.gmra.mrb[36].mxu1 %v69_v0  ;;  %424 = vmatmul.mubr.f32.gmra.mrb[36].mxu0 %v69_v0 }
  0x8d   :  { %840 = vmatprep.mubr.f32.mxu1 %v73_v1  ;;  %429 = vmatprep.mubr.f32.mxu0 %v73_v1 }
  0x90   :  { %841 = vmatmul.mubr.f32.gmra.mrb[38].mxu1 %v72_v2  ;;  %430 = vmatmul.mubr.f32.gmra.mrb[38].mxu0 %v72_v2 }
  0x91   :  { %845 = vmatprep.mubr.f32.mxu1 %v76_v4  ;;  %435 = vmatprep.mubr.f32.mxu0 %v76_v4 }
  0x94   :  { %846 = vmatmul.mubr.f32.gmra.mrb[40].mxu1 %v75_v5  ;;  %436 = vmatmul.mubr.f32.gmra.mrb[40].mxu0 %v75_v5 }
  0x95   :  { %850 = vmatprep.mubr.f32.mxu1 %v79_v6  ;;  %441 = vmatprep.mubr.f32.mxu0 %v79_v6 }
  0x98   :  { %851 = vmatmul.mubr.f32.gmra.mrb[42].mxu1 %v78_v7  ;;  %442 = vmatmul.mubr.f32.gmra.mrb[42].mxu0 %v78_v7 }
  0x99   :  { %855 = vmatprep.mubr.f32.mxu1 %v82_v8  ;;  %447 = vmatprep.mubr.f32.mxu0 %v82_v8 }
  0x9c   :  { %856 = vmatmul.mubr.f32.gmra.mrb[44].mxu1 %v81_v9  ;;  %448 = vmatmul.mubr.f32.gmra.mrb[44].mxu0 %v81_v9 }
  0x9d   :  { %860 = vmatprep.mubr.f32.mxu1 %v85_v10  ;;  %453 = vmatprep.mubr.f32.mxu0 %v85_v10 }
  0xa0   :  { %861 = vmatmul.mubr.f32.gmra.mrb[46].mxu1 %v84_v11  ;;  %454 = vmatmul.mubr.f32.gmra.mrb[46].mxu0 %v84_v11 }
  0xa1   :  { %865 = vmatprep.mubr.f32.mxu1 %v88_v12  ;;  %459 = vmatprep.mubr.f32.mxu0 %v88_v12 }
  0xa4   :  { %866 = vmatmul.mubr.f32.gmra.mrb[48].mxu1 %v87_v13  ;;  %460 = vmatmul.mubr.f32.gmra.mrb[48].mxu0 %v87_v13 }
  0xa5   :  { %1225 = vmatprep.mubr.msk.f32.mxu1 %vm1674_vm0, %v1675_v14  ;;  %530 = vmatprep.mubr.f32.mxu0 %v1675_v14 }
  0xa8   :  { %1226 = vmatmul.mubr.f32.vlgmr.msra.gmra.mrb[0].mxu1 %v17_v15  ;;  %531 = vmatmul.mubr.f32.vlgmr.msra.gmra.mrb[0].mxu0 %v17_v15 }
  0xa9   :  { %1228 = vmatprep.mubr.msk.f32.mxu1 %vm1674_vm0, %v1675_v14  ;;  %536 = vmatprep.mubr.f32.mxu0 %v1675_v14 }
  0xac   :  { %1229 = vmatmul.mubr.f32.gmra.mrb[2].mxu1 %v20_v16  ;;  %537 = vmatmul.mubr.f32.gmra.mrb[2].mxu0 %v20_v16 }
  0xad   :  { %1231 = vmatprep.mubr.msk.f32.mxu1 %vm1674_vm0, %v1675_v14  ;;  %542 = vmatprep.mubr.f32.mxu0 %v1675_v14 }
  0xb0   :  { %1232 = vmatmul.mubr.f32.gmra.mrb[4].mxu1 %v23_v17  ;;  %543 = vmatmul.mubr.f32.gmra.mrb[4].mxu0 %v23_v17 }
  0xb1   :  { %1234 = vmatprep.mubr.msk.f32.mxu1 %vm1674_vm0, %v1675_v14  ;;  %548 = vmatprep.mubr.f32.mxu0 %v1675_v14 }
  0xb4   :  { %1235 = vmatmul.mubr.f32.gmra.mrb[6].mxu1 %v26_v18  ;;  %549 = vmatmul.mubr.f32.gmra.mrb[6].mxu0 %v26_v18 }
  0xb5   :  { %1237 = vmatprep.mubr.msk.f32.mxu1 %vm1674_vm0, %v1675_v14  ;;  %554 = vmatprep.mubr.f32.mxu0 %v1675_v14 }
  0xb8   :  { %1238 = vmatmul.mubr.f32.gmra.mrb[8].mxu1 %v29_v19  ;;  %555 = vmatmul.mubr.f32.gmra.mrb[8].mxu0 %v29_v19 }
  0xb9   :  { %1240 = vmatprep.mubr.msk.f32.mxu1 %vm1674_vm0, %v1675_v14  ;;  %560 = vmatprep.mubr.f32.mxu0 %v1675_v14 }
  0xbc   :  { %1241 = vmatmul.mubr.f32.gmra.mrb[10].mxu1 %v32_v20  ;;  %561 = vmatmul.mubr.f32.gmra.mrb[10].mxu0 %v32_v20 }
  0xbd   :  { %1243 = vmatprep.mubr.msk.f32.mxu1 %vm1674_vm0, %v1675_v14  ;;  %566 = vmatprep.mubr.f32.mxu0 %v1675_v14 }
  0xc0   :  { %1244 = vmatmul.mubr.f32.gmra.mrb[12].mxu1 %v35_v21  ;;  %567 = vmatmul.mubr.f32.gmra.mrb[12].mxu0 %v35_v21 }
  0xc1   :  { %1246 = vmatprep.mubr.msk.f32.mxu1 %vm1674_vm0, %v1675_v14  ;;  %572 = vmatprep.mubr.f32.mxu0 %v1675_v14 }
  0xc4   :  { %1247 = vmatmul.mubr.f32.gmra.mrb[14].mxu1 %v38_v22  ;;  %573 = vmatmul.mubr.f32.gmra.mrb[14].mxu0 %v38_v22 }
  0xc5   :  { %1249 = vmatprep.mubr.msk.f32.mxu1 %vm1674_vm0, %v1675_v14  ;;  %578 = vmatprep.mubr.f32.mxu0 %v1675_v14 }
  0xc8   :  { %1250 = vmatmul.mubr.f32.gmra.mrb[16].mxu1 %v41_v23  ;;  %579 = vmatmul.mubr.f32.gmra.mrb[16].mxu0 %v41_v23 }
  0xc9   :  { %1252 = vmatprep.mubr.msk.f32.mxu1 %vm1674_vm0, %v1675_v14  ;;  %584 = vmatprep.mubr.f32.mxu0 %v1675_v14 }
  0xcc   :  { %1253 = vmatmul.mubr.f32.gmra.mrb[18].mxu1 %v44_v24  ;;  %585 = vmatmul.mubr.f32.gmra.mrb[18].mxu0 %v44_v24 }
  0xcd   :  { %1255 = vmatprep.mubr.msk.f32.mxu1 %vm1674_vm0, %v1675_v14  ;;  %590 = vmatprep.mubr.f32.mxu0 %v1675_v14 }
  0xd0   :  { %1256 = vmatmul.mubr.f32.gmra.mrb[20].mxu1 %v47_v25  ;;  %591 = vmatmul.mubr.f32.gmra.mrb[20].mxu0 %v47_v25 }
  0xd1   :  { %1258 = vmatprep.mubr.msk.f32.mxu1 %vm1674_vm0, %v1675_v14  ;;  %596 = vmatprep.mubr.f32.mxu0 %v1675_v14 }
  0xd4   :  { %1259 = vmatmul.mubr.f32.gmra.mrb[22].mxu1 %v50_v26  ;;  %597 = vmatmul.mubr.f32.gmra.mrb[22].mxu0 %v50_v26 }
  0xd5   :  { %1261 = vmatprep.mubr.msk.f32.mxu1 %vm1674_vm0, %v1675_v14  ;;  %602 = vmatprep.mubr.f32.mxu0 %v1675_v14 }
  0xd8   :  { %1262 = vmatmul.mubr.f32.gmra.mrb[24].mxu1 %v53_v27  ;;  %603 = vmatmul.mubr.f32.gmra.mrb[24].mxu0 %v53_v27 }
  0xd9   :  { %1264 = vmatprep.mubr.msk.f32.mxu1 %vm1674_vm0, %v1675_v14  ;;  %608 = vmatprep.mubr.f32.mxu0 %v1675_v14 }
  0xdc   :  { %1265 = vmatmul.mubr.f32.gmra.mrb[26].mxu1 %v56_v28  ;;  %609 = vmatmul.mubr.f32.gmra.mrb[26].mxu0 %v56_v28 }
  0xdd   :  { %1267 = vmatprep.mubr.msk.f32.mxu1 %vm1674_vm0, %v1675_v14  ;;  %614 = vmatprep.mubr.f32.mxu0 %v1675_v14 }
  0xe0   :  { %1268 = vmatmul.mubr.f32.gmra.mrb[28].mxu1 %v59_v29  ;;  %615 = vmatmul.mubr.f32.gmra.mrb[28].mxu0 %v59_v29 }
  0xe1   :  { %1270 = vmatprep.mubr.msk.f32.mxu1 %vm1674_vm0, %v1675_v14  ;;  %620 = vmatprep.mubr.f32.mxu0 %v1675_v14 }
  0xe4   :  { %1271 = vmatmul.mubr.f32.gmra.mrb[30].mxu1 %v62_v30  ;;  %621 = vmatmul.mubr.f32.gmra.mrb[30].mxu0 %v62_v30 }
  0xe5   :  { %1273 = vmatprep.mubr.msk.f32.mxu1 %vm1674_vm0, %v1675_v14  ;;  %626 = vmatprep.mubr.f32.mxu0 %v1675_v14 }
  0xe8   :  { %1274 = vmatmul.mubr.f32.gmra.mrb[32].mxu1 %v65_v31  ;;  %627 = vmatmul.mubr.f32.gmra.mrb[32].mxu0 %v65_v31 }
  0xe9   :  { %1276 = vmatprep.mubr.msk.f32.mxu1 %vm1674_vm0, %v1675_v14  ;;  %632 = vmatprep.mubr.f32.mxu0 %v1675_v14 }
  0xec   :  { %1277 = vmatmul.mubr.f32.gmra.mrb[34].mxu1 %v68_v32  ;;  %633 = vmatmul.mubr.f32.gmra.mrb[34].mxu0 %v68_v32 }
  0xed   :  { %1279 = vmatprep.mubr.msk.f32.mxu1 %vm1674_vm0, %v1675_v14  ;;  %638 = vmatprep.mubr.f32.mxu0 %v1675_v14 }
  0xf0   :  { %1280 = vmatmul.mubr.f32.gmra.mrb[36].mxu1 %v71_v33  ;;  %639 = vmatmul.mubr.f32.gmra.mrb[36].mxu0 %v71_v33 }
  0xf1   :  { %1282 = vmatprep.mubr.msk.f32.mxu1 %vm1674_vm0, %v1675_v14  ;;  %644 = vmatprep.mubr.f32.mxu0 %v1675_v14 }
  0xf4   :  { %1283 = vmatmul.mubr.f32.gmra.mrb[38].mxu1 %v74_v34  ;;  %645 = vmatmul.mubr.f32.gmra.mrb[38].mxu0 %v74_v34 }
  0xf5   :  { %1285 = vmatprep.mubr.msk.f32.mxu1 %vm1674_vm0, %v1675_v14  ;;  %650 = vmatprep.mubr.f32.mxu0 %v1675_v14 }
  0xf8   :  { %1286 = vmatmul.mubr.f32.gmra.mrb[40].mxu1 %v77_v35  ;;  %651 = vmatmul.mubr.f32.gmra.mrb[40].mxu0 %v77_v35 }
  0xf9   :  { %1288 = vmatprep.mubr.msk.f32.mxu1 %vm1674_vm0, %v1675_v14  ;;  %656 = vmatprep.mubr.f32.mxu0 %v1675_v14 }
  0xfc   :  { %1289 = vmatmul.mubr.f32.gmra.mrb[42].mxu1 %v80_v36  ;;  %657 = vmatmul.mubr.f32.gmra.mrb[42].mxu0 %v80_v36 }
  0xfd   :  { %1291 = vmatprep.mubr.msk.f32.mxu1 %vm1674_vm0, %v1675_v14  ;;  %662 = vmatprep.mubr.f32.mxu0 %v1675_v14 }
 0x100   :  { %1292 = vmatmul.mubr.f32.gmra.mrb[44].mxu1 %v83_v37  ;;  %663 = vmatmul.mubr.f32.gmra.mrb[44].mxu0 %v83_v37 }
 0x101   :  { %1294 = vmatprep.mubr.msk.f32.mxu1 %vm1674_vm0, %v1675_v14  ;;  %668 = vmatprep.mubr.f32.mxu0 %v1675_v14 }
 0x104   :  { %1295 = vmatmul.mubr.f32.gmra.mrb[46].mxu1 %v86_v38  ;;  %669 = vmatmul.mubr.f32.gmra.mrb[46].mxu0 %v86_v38 }
 0x105   :  { %1297 = vmatprep.mubr.msk.f32.mxu1 %vm1674_vm0, %v1675_v14  ;;  %674 = vmatprep.mubr.f32.mxu0 %v1675_v14 }
 0x108   :  { %1298 = vmatmul.mubr.f32.gmra.mrb[48].mxu1 %v89_v39  ;;  %675 = vmatmul.mubr.f32.gmra.mrb[48].mxu0 %v89_v39 }
 0x17b   :  { %v937_v48 = vpop.f32.mrb[0].mxu1  ;;  %v532_v49 = vpop.f32.mrb[0].mxu0 }
 0x17c   :  { %v1518_v50 = vadd.f32 %v937_v48, %v2458_v46  ;;  %v1468_v51 = vadd.f32 %v532_v49, %v2460_v3  ;;  %v1227_v52 = vpop.f32.mrb[1].mxu1  ;;  %v534_v53 = vpop.f32.mrb[1].mxu0 }
 0x17d   :  { %v1469_v54 = vadd.f32 %v534_v53, %v2462_v47 }
 0x17e   :  { %1063 = vst [vmem:[#allocation2 + $0x10] sm:$0xff] %v1518_v50  ;;  %1061 = vst [vmem:[#allocation2] sm:$0xff] %v1468_v51 }
 0x17f   :  { %1062 = vst [vmem:[#allocation2 + $0x8] sm:$0xff] %v1469_v54  ;;  %v942_v55 = vpop.f32.mrb[2].mxu1  ;;  %v538_v56 = vpop.f32.mrb[2].mxu0 }
 0x180   :  { %v1519_v57 = vadd.f32 %v942_v55, %v2458_v46  ;;  %v1470_v58 = vadd.f32 %v538_v56, %v2460_v3  ;;  %v1230_v59 = vpop.f32.mrb[3].mxu1  ;;  %v540_v60 = vpop.f32.mrb[3].mxu0 }
 0x181   :  { %v1471_v61 = vadd.f32 %v540_v60, %v2462_v47 }
 0x182   :  { %1066 = vst [vmem:[#allocation2 + $0x28] sm:$0xff] %v1519_v57  ;;  %1064 = vst [vmem:[#allocation2 + $0x18] sm:$0xff] %v1470_v58 }
 0x183   :  { %1065 = vst [vmem:[#allocation2 + $0x20] sm:$0xff] %v1471_v61  ;;  %v947_v62 = vpop.f32.mrb[4].mxu1  ;;  %v544_v63 = vpop.f32.mrb[4].mxu0 }
 0x184   :  { %v1520_v0 = vadd.f32 %v947_v62, %v2458_v46  ;;  %v1472_v1 = vadd.f32 %v544_v63, %v2460_v3  ;;  %v1233_v2 = vpop.f32.mrb[5].mxu1  ;;  %v546_v4 = vpop.f32.mrb[5].mxu0 }
 0x185   :  { %v1473_v5 = vadd.f32 %v546_v4, %v2462_v47 }
 0x186   :  { %1069 = vst [vmem:[#allocation2 + $0x40] sm:$0xff] %v1520_v0  ;;  %1067 = vst [vmem:[#allocation2 + $0x30] sm:$0xff] %v1472_v1 }
 0x187   :  { %1068 = vst [vmem:[#allocation2 + $0x38] sm:$0xff] %v1473_v5  ;;  %v952_v6 = vpop.f32.mrb[6].mxu1  ;;  %v550_v7 = vpop.f32.mrb[6].mxu0 }
 0x188   :  { %v1521_v8 = vadd.f32 %v952_v6, %v2458_v46  ;;  %v1474_v9 = vadd.f32 %v550_v7, %v2460_v3  ;;  %v1236_v10 = vpop.f32.mrb[7].mxu1  ;;  %v552_v11 = vpop.f32.mrb[7].mxu0 }
 0x189   :  { %v1475_v12 = vadd.f32 %v552_v11, %v2462_v47 }
 0x18a   :  { %1072 = vst [vmem:[#allocation2 + $0x58] sm:$0xff] %v1521_v8  ;;  %1070 = vst [vmem:[#allocation2 + $0x48] sm:$0xff] %v1474_v9 }
 0x18b   :  { %1071 = vst [vmem:[#allocation2 + $0x50] sm:$0xff] %v1475_v12  ;;  %v957_v13 = vpop.f32.mrb[8].mxu1  ;;  %v556_v14 = vpop.f32.mrb[8].mxu0 }
 0x18c   :  { %v1522_v15 = vadd.f32 %v957_v13, %v2458_v46  ;;  %v1476_v16 = vadd.f32 %v556_v14, %v2460_v3  ;;  %v1239_v17 = vpop.f32.mrb[9].mxu1  ;;  %v558_v18 = vpop.f32.mrb[9].mxu0 }
 0x18d   :  { %v1477_v19 = vadd.f32 %v558_v18, %v2462_v47 }
 0x18e   :  { %1075 = vst [vmem:[#allocation2 + $0x70] sm:$0xff] %v1522_v15  ;;  %1073 = vst [vmem:[#allocation2 + $0x60] sm:$0xff] %v1476_v16 }
 0x18f   :  { %1074 = vst [vmem:[#allocation2 + $0x68] sm:$0xff] %v1477_v19  ;;  %v962_v20 = vpop.f32.mrb[10].mxu1  ;;  %v562_v21 = vpop.f32.mrb[10].mxu0 }
 0x190   :  { %v1523_v22 = vadd.f32 %v962_v20, %v2458_v46  ;;  %v1478_v23 = vadd.f32 %v562_v21, %v2460_v3  ;;  %v1242_v24 = vpop.f32.mrb[11].mxu1  ;;  %v564_v25 = vpop.f32.mrb[11].mxu0 }
 0x191   :  { %v1479_v26 = vadd.f32 %v564_v25, %v2462_v47 }
 0x192   :  { %1078 = vst [vmem:[#allocation2 + $0x88] sm:$0xff] %v1523_v22  ;;  %1076 = vst [vmem:[#allocation2 + $0x78] sm:$0xff] %v1478_v23 }
 0x193   :  { %1077 = vst [vmem:[#allocation2 + $0x80] sm:$0xff] %v1479_v26  ;;  %v967_v27 = vpop.f32.mrb[12].mxu1  ;;  %v568_v28 = vpop.f32.mrb[12].mxu0 }
 0x194   :  { %v1524_v29 = vadd.f32 %v967_v27, %v2458_v46  ;;  %v1480_v30 = vadd.f32 %v568_v28, %v2460_v3  ;;  %v1245_v31 = vpop.f32.mrb[13].mxu1  ;;  %v570_v32 = vpop.f32.mrb[13].mxu0 }
 0x195   :  { %v1481_v33 = vadd.f32 %v570_v32, %v2462_v47 }
 0x196   :  { %1081 = vst [vmem:[#allocation2 + $0xa0] sm:$0xff] %v1524_v29  ;;  %1079 = vst [vmem:[#allocation2 + $0x90] sm:$0xff] %v1480_v30 }
 0x197   :  { %1080 = vst [vmem:[#allocation2 + $0x98] sm:$0xff] %v1481_v33  ;;  %v972_v34 = vpop.f32.mrb[14].mxu1  ;;  %v574_v35 = vpop.f32.mrb[14].mxu0 }
 0x198   :  { %v1525_v36 = vadd.f32 %v972_v34, %v2458_v46  ;;  %v1482_v37 = vadd.f32 %v574_v35, %v2460_v3  ;;  %v1248_v38 = vpop.f32.mrb[15].mxu1  ;;  %v576_v39 = vpop.f32.mrb[15].mxu0 }
 0x199   :  { %v1483_v40 = vadd.f32 %v576_v39, %v2462_v47 }
 0x19a   :  { %1084 = vst [vmem:[#allocation2 + $0xb8] sm:$0xff] %v1525_v36  ;;  %1082 = vst [vmem:[#allocation2 + $0xa8] sm:$0xff] %v1482_v37 }
 0x19b   :  { %1083 = vst [vmem:[#allocation2 + $0xb0] sm:$0xff] %v1483_v40  ;;  %v977_v41 = vpop.f32.mrb[16].mxu1  ;;  %v580_v42 = vpop.f32.mrb[16].mxu0 }
 0x19c   :  { %v1526_v43 = vadd.f32 %v977_v41, %v2458_v46  ;;  %v1484_v44 = vadd.f32 %v580_v42, %v2460_v3  ;;  %v1251_v45 = vpop.f32.mrb[17].mxu1  ;;  %v582_v48 = vpop.f32.mrb[17].mxu0 }
 0x19d   :  { %v1485_v49 = vadd.f32 %v582_v48, %v2462_v47 }
 0x19e   :  { %1087 = vst [vmem:[#allocation2 + $0xd0] sm:$0xff] %v1526_v43  ;;  %1085 = vst [vmem:[#allocation2 + $0xc0] sm:$0xff] %v1484_v44 }
 0x19f   :  { %1086 = vst [vmem:[#allocation2 + $0xc8] sm:$0xff] %v1485_v49  ;;  %v982_v50 = vpop.f32.mrb[18].mxu1  ;;  %v586_v51 = vpop.f32.mrb[18].mxu0 }
 0x1a0   :  { %v1527_v52 = vadd.f32 %v982_v50, %v2458_v46  ;;  %v1486_v53 = vadd.f32 %v586_v51, %v2460_v3  ;;  %v1254_v54 = vpop.f32.mrb[19].mxu1  ;;  %v588_v55 = vpop.f32.mrb[19].mxu0 }
 0x1a1   :  { %v1487_v56 = vadd.f32 %v588_v55, %v2462_v47 }
 0x1a2   :  { %1090 = vst [vmem:[#allocation2 + $0xe8] sm:$0xff] %v1527_v52  ;;  %1088 = vst [vmem:[#allocation2 + $0xd8] sm:$0xff] %v1486_v53 }
 0x1a3   :  { %1089 = vst [vmem:[#allocation2 + $0xe0] sm:$0xff] %v1487_v56  ;;  %v987_v57 = vpop.f32.mrb[20].mxu1  ;;  %v592_v58 = vpop.f32.mrb[20].mxu0 }
 0x1a4   :  { %v1528_v59 = vadd.f32 %v987_v57, %v2458_v46  ;;  %v1488_v60 = vadd.f32 %v592_v58, %v2460_v3  ;;  %v1257_v61 = vpop.f32.mrb[21].mxu1  ;;  %v594_v62 = vpop.f32.mrb[21].mxu0 }
 0x1a5   :  { %v1489_v63 = vadd.f32 %v594_v62, %v2462_v47 }
 0x1a6   :  { %1093 = vst [vmem:[#allocation2 + $0x100] sm:$0xff] %v1528_v59  ;;  %1091 = vst [vmem:[#allocation2 + $0xf0] sm:$0xff] %v1488_v60 }
 0x1a7   :  { %1092 = vst [vmem:[#allocation2 + $0xf8] sm:$0xff] %v1489_v63  ;;  %v992_v0 = vpop.f32.mrb[22].mxu1  ;;  %v598_v1 = vpop.f32.mrb[22].mxu0 }
 0x1a8   :  { %v1529_v2 = vadd.f32 %v992_v0, %v2458_v46  ;;  %v1490_v4 = vadd.f32 %v598_v1, %v2460_v3  ;;  %v1260_v5 = vpop.f32.mrb[23].mxu1  ;;  %v600_v6 = vpop.f32.mrb[23].mxu0 }
 0x1a9   :  { %v1491_v7 = vadd.f32 %v600_v6, %v2462_v47 }
 0x1aa   :  { %1096 = vst [vmem:[#allocation2 + $0x118] sm:$0xff] %v1529_v2  ;;  %1094 = vst [vmem:[#allocation2 + $0x108] sm:$0xff] %v1490_v4 }
 0x1ab   :  { %1095 = vst [vmem:[#allocation2 + $0x110] sm:$0xff] %v1491_v7  ;;  %v997_v8 = vpop.f32.mrb[24].mxu1  ;;  %v604_v9 = vpop.f32.mrb[24].mxu0 }
 0x1ac   :  { %v1530_v10 = vadd.f32 %v997_v8, %v2458_v46  ;;  %v1492_v11 = vadd.f32 %v604_v9, %v2460_v3  ;;  %v1263_v12 = vpop.f32.mrb[25].mxu1  ;;  %v606_v13 = vpop.f32.mrb[25].mxu0 }
 0x1ad   :  { %v1493_v14 = vadd.f32 %v606_v13, %v2462_v47 }
 0x1ae   :  { %1099 = vst [vmem:[#allocation2 + $0x130] sm:$0xff] %v1530_v10  ;;  %1097 = vst [vmem:[#allocation2 + $0x120] sm:$0xff] %v1492_v11 }
 0x1af   :  { %1098 = vst [vmem:[#allocation2 + $0x128] sm:$0xff] %v1493_v14  ;;  %v1002_v15 = vpop.f32.mrb[26].mxu1  ;;  %v610_v16 = vpop.f32.mrb[26].mxu0 }
 0x1b0   :  { %v1531_v17 = vadd.f32 %v1002_v15, %v2458_v46  ;;  %v1494_v18 = vadd.f32 %v610_v16, %v2460_v3  ;;  %v1266_v19 = vpop.f32.mrb[27].mxu1  ;;  %v612_v20 = vpop.f32.mrb[27].mxu0 }
 0x1b1   :  { %v1495_v21 = vadd.f32 %v612_v20, %v2462_v47 }
 0x1b2   :  { %1102 = vst [vmem:[#allocation2 + $0x148] sm:$0xff] %v1531_v17  ;;  %1100 = vst [vmem:[#allocation2 + $0x138] sm:$0xff] %v1494_v18 }
 0x1b3   :  { %1101 = vst [vmem:[#allocation2 + $0x140] sm:$0xff] %v1495_v21  ;;  %v1007_v22 = vpop.f32.mrb[28].mxu1  ;;  %v616_v23 = vpop.f32.mrb[28].mxu0 }
 0x1b4   :  { %v1532_v24 = vadd.f32 %v1007_v22, %v2458_v46  ;;  %v1496_v25 = vadd.f32 %v616_v23, %v2460_v3  ;;  %v1269_v26 = vpop.f32.mrb[29].mxu1  ;;  %v618_v27 = vpop.f32.mrb[29].mxu0 }
 0x1b5   :  { %v1497_v28 = vadd.f32 %v618_v27, %v2462_v47 }
 0x1b6   :  { %1105 = vst [vmem:[#allocation2 + $0x160] sm:$0xff] %v1532_v24  ;;  %1103 = vst [vmem:[#allocation2 + $0x150] sm:$0xff] %v1496_v25 }
 0x1b7   :  { %1104 = vst [vmem:[#allocation2 + $0x158] sm:$0xff] %v1497_v28  ;;  %v1012_v29 = vpop.f32.mrb[30].mxu1  ;;  %v622_v30 = vpop.f32.mrb[30].mxu0 }
 0x1b8   :  { %v1533_v31 = vadd.f32 %v1012_v29, %v2458_v46  ;;  %v1498_v32 = vadd.f32 %v622_v30, %v2460_v3  ;;  %v1272_v33 = vpop.f32.mrb[31].mxu1  ;;  %v624_v34 = vpop.f32.mrb[31].mxu0 }
 0x1b9   :  { %v1499_v35 = vadd.f32 %v624_v34, %v2462_v47 }
 0x1ba   :  { %1108 = vst [vmem:[#allocation2 + $0x178] sm:$0xff] %v1533_v31  ;;  %1106 = vst [vmem:[#allocation2 + $0x168] sm:$0xff] %v1498_v32 }
 0x1bb   :  { %1107 = vst [vmem:[#allocation2 + $0x170] sm:$0xff] %v1499_v35  ;;  %v1017_v36 = vpop.f32.mrb[32].mxu1  ;;  %v628_v37 = vpop.f32.mrb[32].mxu0 }
 0x1bc   :  { %v1534_v38 = vadd.f32 %v1017_v36, %v2458_v46  ;;  %v1500_v39 = vadd.f32 %v628_v37, %v2460_v3  ;;  %v1275_v40 = vpop.f32.mrb[33].mxu1  ;;  %v630_v41 = vpop.f32.mrb[33].mxu0 }
 0x1bd   :  { %v1501_v42 = vadd.f32 %v630_v41, %v2462_v47 }
 0x1be   :  { %1111 = vst [vmem:[#allocation2 + $0x190] sm:$0xff] %v1534_v38  ;;  %1109 = vst [vmem:[#allocation2 + $0x180] sm:$0xff] %v1500_v39 }
 0x1bf   :  { %1110 = vst [vmem:[#allocation2 + $0x188] sm:$0xff] %v1501_v42  ;;  %v1022_v43 = vpop.f32.mrb[34].mxu1  ;;  %v634_v44 = vpop.f32.mrb[34].mxu0 }
 0x1c0   :  { %v1535_v45 = vadd.f32 %v1022_v43, %v2458_v46  ;;  %v1502_v48 = vadd.f32 %v634_v44, %v2460_v3  ;;  %v1278_v49 = vpop.f32.mrb[35].mxu1  ;;  %v636_v50 = vpop.f32.mrb[35].mxu0 }
 0x1c1   :  { %v1503_v51 = vadd.f32 %v636_v50, %v2462_v47 }
 0x1c2   :  { %1114 = vst [vmem:[#allocation2 + $0x1a8] sm:$0xff] %v1535_v45  ;;  %1112 = vst [vmem:[#allocation2 + $0x198] sm:$0xff] %v1502_v48 }
 0x1c3   :  { %1113 = vst [vmem:[#allocation2 + $0x1a0] sm:$0xff] %v1503_v51  ;;  %v1027_v52 = vpop.f32.mrb[36].mxu1  ;;  %v640_v53 = vpop.f32.mrb[36].mxu0 }
 0x1c4   :  { %v1536_v54 = vadd.f32 %v1027_v52, %v2458_v46  ;;  %v1504_v55 = vadd.f32 %v640_v53, %v2460_v3  ;;  %v1281_v56 = vpop.f32.mrb[37].mxu1  ;;  %v642_v57 = vpop.f32.mrb[37].mxu0 }
 0x1c5   :  { %v1505_v58 = vadd.f32 %v642_v57, %v2462_v47 }
 0x1c6   :  { %1117 = vst [vmem:[#allocation2 + $0x1c0] sm:$0xff] %v1536_v54  ;;  %1115 = vst [vmem:[#allocation2 + $0x1b0] sm:$0xff] %v1504_v55 }
 0x1c7   :  { %1116 = vst [vmem:[#allocation2 + $0x1b8] sm:$0xff] %v1505_v58  ;;  %v1032_v59 = vpop.f32.mrb[38].mxu1  ;;  %v646_v60 = vpop.f32.mrb[38].mxu0 }
 0x1c8   :  { %v1537_v61 = vadd.f32 %v1032_v59, %v2458_v46  ;;  %v1506_v62 = vadd.f32 %v646_v60, %v2460_v3  ;;  %v1284_v63 = vpop.f32.mrb[39].mxu1  ;;  %v648_v0 = vpop.f32.mrb[39].mxu0 }
 0x1c9   :  { %v1507_v1 = vadd.f32 %v648_v0, %v2462_v47 }
 0x1ca   :  { %1120 = vst [vmem:[#allocation2 + $0x1d8] sm:$0xff] %v1537_v61  ;;  %1118 = vst [vmem:[#allocation2 + $0x1c8] sm:$0xff] %v1506_v62 }
 0x1cb   :  { %1119 = vst [vmem:[#allocation2 + $0x1d0] sm:$0xff] %v1507_v1  ;;  %v1037_v2 = vpop.f32.mrb[40].mxu1  ;;  %v652_v4 = vpop.f32.mrb[40].mxu0 }
 0x1cc   :  { %v1538_v5 = vadd.f32 %v1037_v2, %v2458_v46  ;;  %v1508_v6 = vadd.f32 %v652_v4, %v2460_v3  ;;  %v1287_v7 = vpop.f32.mrb[41].mxu1  ;;  %v654_v8 = vpop.f32.mrb[41].mxu0 }
 0x1cd   :  { %v1509_v9 = vadd.f32 %v654_v8, %v2462_v47 }
 0x1ce   :  { %1123 = vst [vmem:[#allocation2 + $0x1f0] sm:$0xff] %v1538_v5  ;;  %1121 = vst [vmem:[#allocation2 + $0x1e0] sm:$0xff] %v1508_v6 }
 0x1cf   :  { %1122 = vst [vmem:[#allocation2 + $0x1e8] sm:$0xff] %v1509_v9  ;;  %v1042_v10 = vpop.f32.mrb[42].mxu1  ;;  %v658_v11 = vpop.f32.mrb[42].mxu0 }
 0x1d0   :  { %v1539_v12 = vadd.f32 %v1042_v10, %v2458_v46  ;;  %v1510_v13 = vadd.f32 %v658_v11, %v2460_v3  ;;  %v1290_v14 = vpop.f32.mrb[43].mxu1  ;;  %v660_v15 = vpop.f32.mrb[43].mxu0 }
 0x1d1   :  { %v1511_v16 = vadd.f32 %v660_v15, %v2462_v47 }
 0x1d2   :  { %1126 = vst [vmem:[#allocation2 + $0x208] sm:$0xff] %v1539_v12  ;;  %1124 = vst [vmem:[#allocation2 + $0x1f8] sm:$0xff] %v1510_v13 }
 0x1d3   :  { %1125 = vst [vmem:[#allocation2 + $0x200] sm:$0xff] %v1511_v16  ;;  %v1047_v17 = vpop.f32.mrb[44].mxu1  ;;  %v664_v18 = vpop.f32.mrb[44].mxu0 }
 0x1d4   :  { %v1540_v19 = vadd.f32 %v1047_v17, %v2458_v46  ;;  %v1512_v20 = vadd.f32 %v664_v18, %v2460_v3  ;;  %v1293_v21 = vpop.f32.mrb[45].mxu1  ;;  %v666_v22 = vpop.f32.mrb[45].mxu0 }
 0x1d5   :  { %v1513_v23 = vadd.f32 %v666_v22, %v2462_v47 }
 0x1d6   :  { %1129 = vst [vmem:[#allocation2 + $0x220] sm:$0xff] %v1540_v19  ;;  %1127 = vst [vmem:[#allocation2 + $0x210] sm:$0xff] %v1512_v20 }
 0x1d7   :  { %1128 = vst [vmem:[#allocation2 + $0x218] sm:$0xff] %v1513_v23  ;;  %v1052_v24 = vpop.f32.mrb[46].mxu1  ;;  %v670_v25 = vpop.f32.mrb[46].mxu0 }
 0x1d8   :  { %v1541_v26 = vadd.f32 %v1052_v24, %v2458_v46  ;;  %v1514_v27 = vadd.f32 %v670_v25, %v2460_v3  ;;  %v1296_v28 = vpop.f32.mrb[47].mxu1  ;;  %v672_v29 = vpop.f32.mrb[47].mxu0 }
 0x1d9   :  { %v1515_v30 = vadd.f32 %v672_v29, %v2462_v47 }
 0x1da   :  { %1132 = vst [vmem:[#allocation2 + $0x238] sm:$0xff] %v1541_v26  ;;  %1130 = vst [vmem:[#allocation2 + $0x228] sm:$0xff] %v1514_v27 }
 0x1db   :  { %1131 = vst [vmem:[#allocation2 + $0x230] sm:$0xff] %v1515_v30  ;;  %v1057_v31 = vpop.f32.mrb[48].mxu1  ;;  %v676_v32 = vpop.f32.mrb[48].mxu0 }
 0x1dc   :  { %v1542_v33 = vadd.f32 %v1057_v31, %v2458_v46  ;;  %v1516_v34 = vadd.f32 %v676_v32, %v2460_v3  ;;  %v1299_v35 = vpop.f32.mrb[49].mxu1  ;;  %v678_v36 = vpop.f32.mrb[49].mxu0 }
 0x1dd   :  { %v1517_v37 = vadd.f32 %v678_v36, %v2462_v47 }
 0x1de   :  { %1135 = vst [vmem:[#allocation2 + $0x250] sm:$0xff] %v1542_v33  ;;  %1133 = vst [vmem:[#allocation2 + $0x240] sm:$0xff] %v1516_v34 }
 0x1df   :  { %1134 = vst [vmem:[#allocation2 + $0x248] sm:$0xff] %v1517_v37 }
 0x1e0   :  { %1660 = shalt.err (!%p1657_p4)
}
 0x1e1   :  { %s1661_s18 = scalar_lea.hbm %s2554_s3, 9600 }
 0x1e2   :  { %p1662_p5 = scmp.ne.s32.totalorder %s2554_s3, %s1661_s18  ;;  %p1665_p6 = scmp.lt.u32.totalorder %s1661_s18, %s2554_s3 }
 0x1e4   :  { %p1667_p7 = pnand %p1665_p6, %p1662_p5 }
 0x1e6   :  { %1670 = shalt.err (!%p1667_p7)
}
 0x1e7   :  { %s1677_s23 = smov 384   ;;  %s1678_s24 = smov 24  }
 0x1e8   :  { %1147 = dma.vmem_to_hbm [thread:$0]  %s1142_s2, 9600, %s2554_s3, [#allocation3], %s1677_s23, %s1677_s23, %s1678_s24  }
 0x1e9   :  { %1671 = dma.done.wait [#allocation3], 9600  }
 0x1ea   :  { %1672 = vsyncadd [#allocation3], 4294957696 }
 0x1eb   :  { %1151 = vsyncpa [#allocation3], 1 }

</bundles_post_ra>
